<compile_context>
chip_gen: v7x
topology: tpu7x:2x2x1
jax: 0.10.0
libtpu: 0.0.40
codegen_flags: <defaults>
</compile_context>

<pallas_src>
import math
import numpy as np
import jax
import jax.numpy as jnp
from jax import lax
from jax.experimental import pallas as pl
from jax.experimental.pallas import tpu as pltpu


def _round_up(x, m):
    return ((x + m - 1) // m) * m


# ----------------------------------------------------------------------------
# Fused kernel: per-image ROI max-pool bins -> avg -> (last step) MLP epilogue
# ----------------------------------------------------------------------------
def _make_fused_kernel(roi_size):
    inv_bins = 1.0 / float(roi_size * roi_size)

    def kernel(starts_ref, counts_ref, boxes_ref, dest_ref,   # SMEM (prefetch)
               fmap_ref, w1_ref, b1_ref, w2_ref, b2_ref,      # VMEM inputs
               cls_ref,                                        # VMEM output
               pooled_ref):                                    # VMEM scratch
        n = pl.program_id(0)
        _, H, W, C = fmap_ref.shape

        @pl.when(n == 0)
        def _init():
            # padded ROI rows stay 0 -> harmless, sliced off in the wrapper
            pooled_ref[...] = jnp.zeros_like(pooled_ref)

        # bf16 over DMA; upcast to f32 once per image (v5e has no bf16 VALU).
        img = fmap_ref[0].astype(jnp.float32)                   # (H, W, C)

        col_ids = lax.broadcasted_iota(jnp.int32, (1, W, 1), 1)  # W-axis iota
        row_ids = lax.broadcasted_iota(jnp.int32, (H, 1), 0)     # H-axis iota

        start = starts_ref[n]
        count = counts_ref[n]

        def roi_body(j, carry):
            r = start + j                       # index into image-sorted ROIs
            x1 = boxes_ref[4 * r + 0]
            y1 = boxes_ref[4 * r + 1]
            x2 = boxes_ref[4 * r + 2]
            y2 = boxes_ref[4 * r + 3]
            roi_w = jnp.maximum(x2 - x1 + 1, 1)
            roi_h = jnp.maximum(y2 - y1 + 1, 1)
            bin_h = roi_h.astype(jnp.float32) / float(roi_size)
            bin_w = roi_w.astype(jnp.float32) / float(roi_size)

            # Row-bin masks (tiny (H,1) vectors) computed once per ROI.
            hmasks, hempty = [], []
            for ph in range(roi_size):
                hs = jnp.clip(jnp.floor(ph * bin_h).astype(jnp.int32) + y1,
                              0, H)
                he = jnp.clip(jnp.ceil((ph + 1) * bin_h).astype(jnp.int32) + y1,
                              0, H)
                hmasks.append((row_ids >= hs) & (row_ids < he))   # (H, 1)
                hempty.append(he <= hs)

            # Each column-bin partial (H, C) is folded into the row-bin
            # accumulators immediately -> only one (H, C) value live at a time.
            acc = jnp.zeros((1, C), jnp.float32)
            for pw in range(roi_size):
                ws = jnp.clip(jnp.floor(pw * bin_w).astype(jnp.int32) + x1,
                              0, W)
                we = jnp.clip(jnp.ceil((pw + 1) * bin_w).astype(jnp.int32) + x1,
                              0, W)
                wmask = (col_ids >= ws) & (col_ids < we)          # (1, W, 1)
                w_empty = we <= ws
                cm = jnp.max(jnp.where(wmask, img, -jnp.inf), axis=1)  # (H, C)
                for ph in range(roi_size):
                    bm = jnp.max(jnp.where(hmasks[ph], cm, -jnp.inf),
                                 axis=0, keepdims=True)           # (1, C)
                    empty = jnp.logical_or(w_empty, hempty[ph])
                    acc = acc + jnp.where(empty, 0.0, bm)

            dst = dest_ref[r]                 # original ROI index (scatter row)
            # TODO(synk): with hundreds of ROIs/image, stage 8-row chunks and
            # do sublane-aligned stores instead of one masked row store each.
            pooled_ref[pl.ds(dst, 1), :] = acc * inv_bins
            return carry

        lax.fori_loop(0, count, roi_body, 0)

        # ---- epilogue: fc -> relu(dropout) -> cls_head on the last step ----
        @pl.when(n == pl.num_programs(0) - 1)
        def _epilogue():
            # TODO(synk): nn.Dropout(p=0.3) (train mode) and the
            # BCE-with-logits training branch are not implemented (eval only).
            # TODO(synk): at large hidden/n_classes cast the matmul operands
            # to bf16 (MXU-native) while keeping f32 accumulation.
            h = jnp.dot(pooled_ref[...], w1_ref[...],
                        preferred_element_type=jnp.float32) + b1_ref[...]
            h = jnp.maximum(h, 0.0)
            cls_ref[...] = jnp.dot(h, w2_ref[...],
                                   preferred_element_type=jnp.float32) + b2_ref[...]

    return kernel


# ----------------------------------------------------------------------------
# Wrapper: layout prep, ROI grouping, pallas_call
# ----------------------------------------------------------------------------
def classification_module_forward(fmap_nchw, batch_idx, boxes, params, roi_size):
    """Eval-mode forward of ClassificationModule -> cls_scores (K, n_classes)."""
    N, C, H, W = fmap_nchw.shape
    K = boxes.shape[0]
    hidden = params["w1"].shape[1]
    n_classes = params["w2"].shape[1]

    Hd_pad = _round_up(hidden, 128)
    NC_pad = _round_up(n_classes, 128)
    K_pad = _round_up(K, 8)

    # Feature map: NHWC, bf16 over DMA, NO channel padding (block covers the
    # full array extents so the (8,128) tiling rule is satisfied).
    # TODO(synk): in a production pipeline produce the NHWC/bf16 layout once
    # upstream instead of per call.
    fmap_p = jnp.transpose(fmap_nchw, (0, 2, 3, 1)).astype(jnp.bfloat16)

    # Only the MLP weights / biases are lane-padded (zero-pad keeps results
    # exact; padded output columns are sliced off at the end).
    w1p = jnp.zeros((C, Hd_pad), jnp.float32).at[:, :hidden].set(
        params["w1"].astype(jnp.float32))
    b1p = jnp.zeros((1, Hd_pad), jnp.float32).at[:, :hidden].set(
        params["b1"].astype(jnp.float32).reshape(1, hidden))
    w2p = jnp.zeros((Hd_pad, NC_pad), jnp.float32).at[:hidden, :n_classes].set(
        params["w2"].astype(jnp.float32))
    b2p = jnp.zeros((1, NC_pad), jnp.float32).at[:, :n_classes].set(
        params["b2"].astype(jnp.float32).reshape(1, n_classes))

    # Group ROIs by image so each feature map is DMA'd exactly once.
    batch_idx = batch_idx.astype(jnp.int32)
    order = jnp.argsort(batch_idx)                        # ROIs in image order
    boxes_sorted = boxes.astype(jnp.int32)[order]         # (K, 4)
    counts = jnp.zeros((N,), jnp.int32).at[batch_idx].add(1)
    starts = jnp.concatenate(
        [jnp.zeros((1,), jnp.int32),
         jnp.cumsum(counts)[:-1].astype(jnp.int32)])
    boxes_flat = boxes_sorted.reshape(-1)                 # 1-D SMEM friendly
    dest = order.astype(jnp.int32)                        # sorted -> orig row

    # Explicit scoped-VMEM budget (v5e default is only 16 MiB): double-buffered
    # fmap block + (default double-buffered) weights + pooled slab + output.
    fmap_block_bytes = H * W * C * 2                      # bf16
    weight_bytes = (C * Hd_pad + Hd_pad + Hd_pad * NC_pad + NC_pad) * 4
    pooled_bytes = K_pad * C * 4
    out_bytes = K_pad * NC_pad * 4
    vmem_limit = int(min(
        2 * fmap_block_bytes + 2 * weight_bytes + pooled_bytes + 2 * out_bytes
        + (8 << 20),                                      # headroom
        64 << 20))                                        # v7x-safe ceiling

    kernel = _make_fused_kernel(roi_size)
    cls_padded = pl.pallas_call(
        kernel,
        out_shape=jax.ShapeDtypeStruct((K_pad, NC_pad), jnp.float32),
        grid_spec=pltpu.PrefetchScalarGridSpec(
            num_scalar_prefetch=4,
            grid=(N,),
            in_specs=[
                pl.BlockSpec((1, H, W, C),
                             lambda n, s, c, b, d: (n, 0, 0, 0)),
                pl.BlockSpec((C, Hd_pad), lambda n, s, c, b, d: (0, 0)),
                pl.BlockSpec((1, Hd_pad), lambda n, s, c, b, d: (0, 0)),
                pl.BlockSpec((Hd_pad, NC_pad), lambda n, s, c, b, d: (0, 0)),
                pl.BlockSpec((1, NC_pad), lambda n, s, c, b, d: (0, 0)),
            ],
            out_specs=pl.BlockSpec((K_pad, NC_pad),
                                   lambda n, s, c, b, d: (0, 0)),
            scratch_shapes=[pltpu.VMEM((K_pad, C), jnp.float32)],
        ),
        compiler_params=pltpu.CompilerParams(
            dimension_semantics=("arbitrary",),
            vmem_limit_bytes=vmem_limit),
    )(starts, counts, boxes_flat, dest, fmap_p, w1p, b1p, w2p, b2p)

    return cls_padded[:K, :n_classes]


# ----------------------------------------------------------------------------
# Pure NumPy reference (torchvision roi_pool + AvgPool2d + fc/relu/cls_head)
# ----------------------------------------------------------------------------
def reference(fmap, batch_idx, boxes, params, roi_size):
    fmap = np.asarray(fmap, np.float32)
    N, C, H, W = fmap.shape
    K = boxes.shape[0]
    pooled = np.zeros((K, C), np.float32)
    for r in range(K):
        b = int(batch_idx[r])
        x1, y1, x2, y2 = [int(v) for v in np.asarray(boxes[r])]
        roi_w = max(x2 - x1 + 1, 1)
        roi_h = max(y2 - y1 + 1, 1)
        bh = roi_h / roi_size
        bw = roi_w / roi_size
        acc = np.zeros((C,), np.float32)
        for ph in range(roi_size):
            for pw in range(roi_size):
                hs = min(max(int(np.floor(ph * bh)) + y1, 0), H)
                he = min(max(int(np.ceil((ph + 1) * bh)) + y1, 0), H)
                ws = min(max(int(np.floor(pw * bw)) + x1, 0), W)
                we = min(max(int(np.ceil((pw + 1) * bw)) + x1, 0), W)
                if he <= hs or we <= ws:
                    val = np.zeros((C,), np.float32)
                else:
                    val = fmap[b, :, hs:he, ws:we].max(axis=(1, 2))
                acc += val
        pooled[r] = acc / (roi_size * roi_size)
    h = np.maximum(pooled @ np.asarray(params["w1"]) + np.asarray(params["b1"]),
                   0.0)
    return h @ np.asarray(params["w2"]) + np.asarray(params["b2"])


# ----------------------------------------------------------------------------
if __name__ == "__main__":
    # Small shapes consistent with the module.
    N, C, H, W = 2, 8, 16, 16      # feature map (out_channels = C)
    roi_size = 2
    hidden_dim = 32
    n_classes = 5
    num_rois = 6

    key = jax.random.PRNGKey(0)
    kf, kx, ky, kw, kh, kbi, k1, k2, k3, k4 = jax.random.split(key, 10)

    feature_map = jax.random.normal(kf, (N, C, H, W), dtype=jnp.float32)
    # Quantize to bf16-representable values so the bf16-DMA kernel and the f32
    # reference see identical inputs (max pooling is then exact in both).
    feature_map = feature_map.astype(jnp.bfloat16).astype(jnp.float32)

    x1 = jax.random.randint(kx, (num_rois,), 0, W // 2)
    y1 = jax.random.randint(ky, (num_rois,), 0, H // 2)
    x2 = jnp.minimum(x1 + jax.random.randint(kw, (num_rois,), 1, W // 2), W - 1)
    y2 = jnp.minimum(y1 + jax.random.randint(kh, (num_rois,), 1, H // 2), H - 1)
    boxes = jnp.stack([x1, y1, x2, y2], axis=1).astype(jnp.int32)
    batch_idx = jax.random.randint(kbi, (num_rois,), 0, N).astype(jnp.int32)

    # Deterministic parameter init (PyTorch-Linear-style uniform bounds).
    lim1 = 1.0 / math.sqrt(C)
    lim2 = 1.0 / math.sqrt(hidden_dim)
    params = {
        "w1": jax.random.uniform(k1, (C, hidden_dim), jnp.float32, -lim1, lim1),
        "b1": jax.random.uniform(k2, (1, hidden_dim), jnp.float32, -lim1, lim1),
        "w2": jax.random.uniform(k3, (hidden_dim, n_classes), jnp.float32,
                                 -lim2, lim2),
        "b2": jax.random.uniform(k4, (1, n_classes), jnp.float32, -lim2, lim2),
    }

    cls_scores = classification_module_forward(
        feature_map, batch_idx, boxes, params, roi_size)
    cls_scores = jax.block_until_ready(cls_scores)

    ref = reference(feature_map, batch_idx, boxes, params, roi_size)
    assert cls_scores.shape == (num_rois, n_classes)
    np.testing.assert_allclose(np.asarray(cls_scores), ref, rtol=1e-3, atol=1e-3)

    print("KERNEL_OK")
</pallas_src>

<mosaic_0001>
module attributes {stable_mosaic.version = 11 : i64} {
  func.func @kernel(%arg0: i32, %arg1: memref<2xi32, #tpu.memory_space<smem>>, %arg2: memref<2xi32, #tpu.memory_space<smem>>, %arg3: memref<24xi32, #tpu.memory_space<smem>>, %arg4: memref<6xi32, #tpu.memory_space<smem>>, %arg5: memref<1x16x16x8xbf16, #tpu.memory_space<vmem>>, %arg6: memref<8x128xf32, #tpu.memory_space<vmem>>, %arg7: memref<1x128xf32, #tpu.memory_space<vmem>>, %arg8: memref<128x128xf32, #tpu.memory_space<vmem>>, %arg9: memref<1x128xf32, #tpu.memory_space<vmem>>, %arg10: memref<8x128xf32, #tpu.memory_space<vmem>>, %arg11: memref<8x8xf32, #tpu.memory_space<vmem>>) attributes {dimension_semantics = [#tpu.dimension_semantics<arbitrary>], iteration_bounds = array<i64: 2>, scalar_prefetch = 4 : i64, scratch_operands = 1 : i64, tpu.core_type = #tpu.core_type<tc>, window_params = [{transform_indices = @transform_0, window_bounds = array<i64: 1, 16, 16, 8>}, {pipeline_mode = #tpu.pipeline_mode<synchronous>, transform_indices = @transform_1, window_bounds = array<i64: 8, 128>}, {pipeline_mode = #tpu.pipeline_mode<synchronous>, transform_indices = @transform_2, window_bounds = array<i64: 1, 128>}, {pipeline_mode = #tpu.pipeline_mode<synchronous>, transform_indices = @transform_3, window_bounds = array<i64: 128, 128>}, {pipeline_mode = #tpu.pipeline_mode<synchronous>, transform_indices = @transform_4, window_bounds = array<i64: 1, 128>}, {pipeline_mode = #tpu.pipeline_mode<synchronous>, transform_indices = @transform_5, window_bounds = array<i64: 8, 128>}]} {
    %c0_i32 = arith.constant 0 : i32
    %0 = arith.cmpi eq, %arg0, %c0_i32 : i32
    %1 = arith.extui %0 : i1 to i32
    %c0_i32_0 = arith.constant 0 : i32
    %2 = arith.cmpi ne, %1, %c0_i32_0 : i32
    scf.if %2 {
      %cst = arith.constant 0.000000e+00 : f32
      %17 = vector.broadcast %cst : f32 to vector<8x8xf32>
      %c0_8 = arith.constant 0 : index
      %c0_9 = arith.constant 0 : index
      %18 = vector.load %arg11[%c0_8, %c0_9] : memref<8x8xf32, #tpu.memory_space<vmem>>, vector<8x8xf32>
      tpu.vector_store %arg11[%c0_8, %c0_9], %17 {strides = array<i32>} : memref<8x8xf32, #tpu.memory_space<vmem>>, vector<8x8xf32>,
    } else {
    }
    %c0 = arith.constant 0 : index
    %c0_1 = arith.constant 0 : index
    %c0_2 = arith.constant 0 : index
    %c0_3 = arith.constant 0 : index
    %3 = vector.load %arg5[%c0, %c0_1, %c0_2, %c0_3] : memref<1x16x16x8xbf16, #tpu.memory_space<vmem>>, vector<1x16x16x8xbf16>
    %4 = vector.shape_cast %3 : vector<1x16x16x8xbf16> to vector<16x16x8xbf16>
    %5 = arith.extf %4 : vector<16x16x8xbf16> to vector<16x16x8xf32>
    %6 = tpu.iota {dimensions = array<i32: 1>} : vector<1x16x1xi32>
    %7 = tpu.iota {dimensions = array<i32: 0>} : vector<16x1xi32>
    %8 = arith.index_cast %arg0 : i32 to index
    %9 = memref.load %arg1[%8] : memref<2xi32, #tpu.memory_space<smem>>
    %10 = arith.index_cast %arg0 : i32 to index
    %11 = memref.load %arg2[%10] : memref<2xi32, #tpu.memory_space<smem>>
    %c0_i32_4 = arith.constant 0 : i32
    %c0_i32_5 = arith.constant 0 : i32
    %12 = arith.subi %11, %c0_i32_5 : i32
    %13 = arith.addi %c0_i32_5, %12 : i32
    %c1_i32 = arith.constant 1 : i32
    scf.for %arg12 = %c0_i32_5 to %13 step %c1_i32  : i32 {
      %17 = arith.addi %9, %arg12 : i32
      %c4_i32 = arith.constant 4 : i32
      %18 = arith.muli %c4_i32, %17 : i32
      %c0_i32_8 = arith.constant 0 : i32
      %19 = arith.addi %18, %c0_i32_8 : i32
      %20 = arith.index_cast %19 : i32 to index
      %21 = memref.load %arg3[%20] : memref<24xi32, #tpu.memory_space<smem>>
      %c4_i32_9 = arith.constant 4 : i32
      %22 = arith.muli %c4_i32_9, %17 : i32
      %c1_i32_10 = arith.constant 1 : i32
      %23 = arith.addi %22, %c1_i32_10 : i32
      %24 = arith.index_cast %23 : i32 to index
      %25 = memref.load %arg3[%24] : memref<24xi32, #tpu.memory_space<smem>>
      %c4_i32_11 = arith.constant 4 : i32
      %26 = arith.muli %c4_i32_11, %17 : i32
      %c2_i32 = arith.constant 2 : i32
      %27 = arith.addi %26, %c2_i32 : i32
      %28 = arith.index_cast %27 : i32 to index
      %29 = memref.load %arg3[%28] : memref<24xi32, #tpu.memory_space<smem>>
      %c4_i32_12 = arith.constant 4 : i32
      %30 = arith.muli %c4_i32_12, %17 : i32
      %c3_i32 = arith.constant 3 : i32
      %31 = arith.addi %30, %c3_i32 : i32
      %32 = arith.index_cast %31 : i32 to index
      %33 = memref.load %arg3[%32] : memref<24xi32, #tpu.memory_space<smem>>
      %34 = arith.subi %29, %21 : i32
      %c1_i32_13 = arith.constant 1 : i32
      %35 = arith.addi %34, %c1_i32_13 : i32
      %c1_i32_14 = arith.constant 1 : i32
      %36 = arith.maxsi %35, %c1_i32_14 : i32
      %37 = arith.subi %33, %25 : i32
      %c1_i32_15 = arith.constant 1 : i32
      %38 = arith.addi %37, %c1_i32_15 : i32
      %c1_i32_16 = arith.constant 1 : i32
      %39 = arith.maxsi %38, %c1_i32_16 : i32
      %40 = arith.sitofp %39 : i32 to f32
      %cst = arith.constant 2.000000e+00 : f32
      %41 = arith.divf %40, %cst : f32
      %42 = arith.sitofp %36 : i32 to f32
      %cst_17 = arith.constant 2.000000e+00 : f32
      %43 = arith.divf %42, %cst_17 : f32
      %cst_18 = arith.constant 0.000000e+00 : f32
      %44 = arith.mulf %cst_18, %41 : f32
      %45 = math.floor %44 : f32
      %46 = arith.fptosi %45 : f32 to i32
      %47 = arith.addi %46, %25 : i32
      %c0_i32_19 = arith.constant 0 : i32
      %c16_i32 = arith.constant 16 : i32
      %48 = arith.maxsi %c0_i32_19, %47 : i32
      %49 = arith.minsi %c16_i32, %48 : i32
      %cst_20 = arith.constant 1.000000e+00 : f32
      %50 = arith.mulf %cst_20, %41 : f32
      %51 = math.ceil %50 : f32
      %52 = arith.fptosi %51 : f32 to i32
      %53 = arith.addi %52, %25 : i32
      %c0_i32_21 = arith.constant 0 : i32
      %c16_i32_22 = arith.constant 16 : i32
      %54 = arith.maxsi %c0_i32_21, %53 : i32
      %55 = arith.minsi %c16_i32_22, %54 : i32
      %56 = vector.broadcast %49 : i32 to vector<16x1xi32>
      %57 = arith.cmpi sge, %7, %56 : vector<16x1xi32>
      %58 = vector.broadcast %55 : i32 to vector<16x1xi32>
      %59 = arith.cmpi slt, %7, %58 : vector<16x1xi32>
      %60 = arith.andi %57, %59 : vector<16x1xi1>
      %61 = arith.cmpi sle, %55, %49 : i32
      %cst_23 = arith.constant 1.000000e+00 : f32
      %62 = arith.mulf %cst_23, %41 : f32
      %63 = math.floor %62 : f32
      %64 = arith.fptosi %63 : f32 to i32
      %65 = arith.addi %64, %25 : i32
      %c0_i32_24 = arith.constant 0 : i32
      %c16_i32_25 = arith.constant 16 : i32
      %66 = arith.maxsi %c0_i32_24, %65 : i32
      %67 = arith.minsi %c16_i32_25, %66 : i32
      %cst_26 = arith.constant 2.000000e+00 : f32
      %68 = arith.mulf %cst_26, %41 : f32
      %69 = math.ceil %68 : f32
      %70 = arith.fptosi %69 : f32 to i32
      %71 = arith.addi %70, %25 : i32
      %c0_i32_27 = arith.constant 0 : i32
      %c16_i32_28 = arith.constant 16 : i32
      %72 = arith.maxsi %c0_i32_27, %71 : i32
      %73 = arith.minsi %c16_i32_28, %72 : i32
      %74 = vector.broadcast %67 : i32 to vector<16x1xi32>
      %75 = arith.cmpi sge, %7, %74 : vector<16x1xi32>
      %76 = vector.broadcast %73 : i32 to vector<16x1xi32>
      %77 = arith.cmpi slt, %7, %76 : vector<16x1xi32>
      %78 = arith.andi %75, %77 : vector<16x1xi1>
      %79 = arith.cmpi sle, %73, %67 : i32
      %cst_29 = arith.constant 0.000000e+00 : f32
      %80 = vector.broadcast %cst_29 : f32 to vector<1x8xf32>
      %cst_30 = arith.constant 0.000000e+00 : f32
      %81 = arith.mulf %cst_30, %43 : f32
      %82 = math.floor %81 : f32
      %83 = arith.fptosi %82 : f32 to i32
      %84 = arith.addi %83, %21 : i32
      %c0_i32_31 = arith.constant 0 : i32
      %c16_i32_32 = arith.constant 16 : i32
      %85 = arith.maxsi %c0_i32_31, %84 : i32
      %86 = arith.minsi %c16_i32_32, %85 : i32
      %cst_33 = arith.constant 1.000000e+00 : f32
      %87 = arith.mulf %cst_33, %43 : f32
      %88 = math.ceil %87 : f32
      %89 = arith.fptosi %88 : f32 to i32
      %90 = arith.addi %89, %21 : i32
      %c0_i32_34 = arith.constant 0 : i32
      %c16_i32_35 = arith.constant 16 : i32
      %91 = arith.maxsi %c0_i32_34, %90 : i32
      %92 = arith.minsi %c16_i32_35, %91 : i32
      %93 = vector.broadcast %86 : i32 to vector<1x16x1xi32>
      %94 = arith.cmpi sge, %6, %93 : vector<1x16x1xi32>
      %95 = vector.broadcast %92 : i32 to vector<1x16x1xi32>
      %96 = arith.cmpi slt, %6, %95 : vector<1x16x1xi32>
      %97 = arith.andi %94, %96 : vector<1x16x1xi1>
      %98 = arith.cmpi sle, %92, %86 : i32
      %cst_36 = arith.constant 0xFF800000 : f32
      %99 = vector.shape_cast %97 : vector<1x16x1xi1> to vector<1x16x1xi1>
      %100 = vector.broadcast %99 : vector<1x16x1xi1> to vector<16x16x8xi1>
      %101 = vector.broadcast %cst_36 : f32 to vector<16x16x8xf32>
      %102 = arith.select %100, %5, %101 : vector<16x16x8xi1>, vector<16x16x8xf32>
      %cst_37 = arith.constant dense<0xFF800000> : vector<16x8xf32>
      %103 = vector.multi_reduction <maximumf>, %102, %cst_37 [1] : vector<16x16x8xf32> to vector<16x8xf32>
      %cst_38 = arith.constant 0xFF800000 : f32
      %104 = vector.shape_cast %60 : vector<16x1xi1> to vector<16x1xi1>
      %105 = vector.broadcast %104 : vector<16x1xi1> to vector<16x8xi1>
      %106 = vector.broadcast %cst_38 : f32 to vector<16x8xf32>
      %107 = arith.select %105, %103, %106 : vector<16x8xi1>, vector<16x8xf32>
      %cst_39 = arith.constant dense<0xFF800000> : vector<8xf32>
      %108 = vector.multi_reduction <maximumf>, %107, %cst_39 [0] : vector<16x8xf32> to vector<8xf32>
      %109 = vector.shape_cast %108 : vector<8xf32> to vector<1x8xf32>
      %110 = arith.ori %98, %61 : i1
      %cst_40 = arith.constant 0.000000e+00 : f32
      %111 = vector.broadcast %cst_40 : f32 to vector<1x8xf32>
      %112 = arith.select %110, %111, %109 : vector<1x8xf32>
      %113 = arith.addf %80, %112 : vector<1x8xf32>
      %cst_41 = arith.constant 0xFF800000 : f32
      %114 = vector.shape_cast %78 : vector<16x1xi1> to vector<16x1xi1>
      %115 = vector.broadcast %114 : vector<16x1xi1> to vector<16x8xi1>
      %116 = vector.broadcast %cst_41 : f32 to vector<16x8xf32>
      %117 = arith.select %115, %103, %116 : vector<16x8xi1>, vector<16x8xf32>
      %cst_42 = arith.constant dense<0xFF800000> : vector<8xf32>
      %118 = vector.multi_reduction <maximumf>, %117, %cst_42 [0] : vector<16x8xf32> to vector<8xf32>
      %119 = vector.shape_cast %118 : vector<8xf32> to vector<1x8xf32>
      %120 = arith.ori %98, %79 : i1
      %cst_43 = arith.constant 0.000000e+00 : f32
      %121 = vector.broadcast %cst_43 : f32 to vector<1x8xf32>
      %122 = arith.select %120, %121, %119 : vector<1x8xf32>
      %123 = arith.addf %113, %122 : vector<1x8xf32>
      %cst_44 = arith.constant 1.000000e+00 : f32
      %124 = arith.mulf %cst_44, %43 : f32
      %125 = math.floor %124 : f32
      %126 = arith.fptosi %125 : f32 to i32
      %127 = arith.addi %126, %21 : i32
      %c0_i32_45 = arith.constant 0 : i32
      %c16_i32_46 = arith.constant 16 : i32
      %128 = arith.maxsi %c0_i32_45, %127 : i32
      %129 = arith.minsi %c16_i32_46, %128 : i32
      %cst_47 = arith.constant 2.000000e+00 : f32
      %130 = arith.mulf %cst_47, %43 : f32
      %131 = math.ceil %130 : f32
      %132 = arith.fptosi %131 : f32 to i32
      %133 = arith.addi %132, %21 : i32
      %c0_i32_48 = arith.constant 0 : i32
      %c16_i32_49 = arith.constant 16 : i32
      %134 = arith.maxsi %c0_i32_48, %133 : i32
      %135 = arith.minsi %c16_i32_49, %134 : i32
      %136 = vector.broadcast %129 : i32 to vector<1x16x1xi32>
      %137 = arith.cmpi sge, %6, %136 : vector<1x16x1xi32>
      %138 = vector.broadcast %135 : i32 to vector<1x16x1xi32>
      %139 = arith.cmpi slt, %6, %138 : vector<1x16x1xi32>
      %140 = arith.andi %137, %139 : vector<1x16x1xi1>
      %141 = arith.cmpi sle, %135, %129 : i32
      %cst_50 = arith.constant 0xFF800000 : f32
      %142 = vector.shape_cast %140 : vector<1x16x1xi1> to vector<1x16x1xi1>
      %143 = vector.broadcast %142 : vector<1x16x1xi1> to vector<16x16x8xi1>
      %144 = vector.broadcast %cst_50 : f32 to vector<16x16x8xf32>
      %145 = arith.select %143, %5, %144 : vector<16x16x8xi1>, vector<16x16x8xf32>
      %cst_51 = arith.constant dense<0xFF800000> : vector<16x8xf32>
      %146 = vector.multi_reduction <maximumf>, %145, %cst_51 [1] : vector<16x16x8xf32> to vector<16x8xf32>
      %cst_52 = arith.constant 0xFF800000 : f32
      %147 = vector.shape_cast %60 : vector<16x1xi1> to vector<16x1xi1>
      %148 = vector.broadcast %147 : vector<16x1xi1> to vector<16x8xi1>
      %149 = vector.broadcast %cst_52 : f32 to vector<16x8xf32>
      %150 = arith.select %148, %146, %149 : vector<16x8xi1>, vector<16x8xf32>
      %cst_53 = arith.constant dense<0xFF800000> : vector<8xf32>
      %151 = vector.multi_reduction <maximumf>, %150, %cst_53 [0] : vector<16x8xf32> to vector<8xf32>
      %152 = vector.shape_cast %151 : vector<8xf32> to vector<1x8xf32>
      %153 = arith.ori %141, %61 : i1
      %cst_54 = arith.constant 0.000000e+00 : f32
      %154 = vector.broadcast %cst_54 : f32 to vector<1x8xf32>
      %155 = arith.select %153, %154, %152 : vector<1x8xf32>
      %156 = arith.addf %123, %155 : vector<1x8xf32>
      %cst_55 = arith.constant 0xFF800000 : f32
      %157 = vector.shape_cast %78 : vector<16x1xi1> to vector<16x1xi1>
      %158 = vector.broadcast %157 : vector<16x1xi1> to vector<16x8xi1>
      %159 = vector.broadcast %cst_55 : f32 to vector<16x8xf32>
      %160 = arith.select %158, %146, %159 : vector<16x8xi1>, vector<16x8xf32>
      %cst_56 = arith.constant dense<0xFF800000> : vector<8xf32>
      %161 = vector.multi_reduction <maximumf>, %160, %cst_56 [0] : vector<16x8xf32> to vector<8xf32>
      %162 = vector.shape_cast %161 : vector<8xf32> to vector<1x8xf32>
      %163 = arith.ori %141, %79 : i1
      %cst_57 = arith.constant 0.000000e+00 : f32
      %164 = vector.broadcast %cst_57 : f32 to vector<1x8xf32>
      %165 = arith.select %163, %164, %162 : vector<1x8xf32>
      %166 = arith.addf %156, %165 : vector<1x8xf32>
      %167 = arith.index_cast %17 : i32 to index
      %168 = memref.load %arg4[%167] : memref<6xi32, #tpu.memory_space<smem>>
      %cst_58 = arith.constant 2.500000e-01 : f32
      %169 = vector.broadcast %cst_58 : f32 to vector<1x8xf32>
      %170 = arith.mulf %166, %169 : vector<1x8xf32>
      %171 = arith.index_cast %168 : i32 to index
      %c0_59 = arith.constant 0 : index
      %172 = vector.load %arg11[%171, %c0_59] : memref<8x8xf32, #tpu.memory_space<vmem>>, vector<1x8xf32>
      tpu.vector_store %arg11[%171, %c0_59], %170 {strides = array<i32>} : memref<8x8xf32, #tpu.memory_space<vmem>>, vector<1x8xf32>,
    }
    %c1_i32_6 = arith.constant 1 : i32
    %14 = arith.cmpi eq, %arg0, %c1_i32_6 : i32
    %15 = arith.extui %14 : i1 to i32
    %c0_i32_7 = arith.constant 0 : i32
    %16 = arith.cmpi ne, %15, %c0_i32_7 : i32
    scf.if %16 {
      %c0_8 = arith.constant 0 : index
      %c0_9 = arith.constant 0 : index
      %17 = vector.load %arg11[%c0_8, %c0_9] : memref<8x8xf32, #tpu.memory_space<vmem>>, vector<8x8xf32>
      %c0_10 = arith.constant 0 : index
      %c0_11 = arith.constant 0 : index
      %18 = vector.load %arg6[%c0_10, %c0_11] : memref<8x128xf32, #tpu.memory_space<vmem>>, vector<8x128xf32>
      %cst = arith.constant dense<0.000000e+00> : vector<8x128xf32>
      %19 = tpu.matmul %17, %18, %cst {dimension_numbers = #tpu.dot_dimension_numbers<[1], [0], [0], [1], [0, 0, 1, 1], [], []>} : vector<8x8xf32>, vector<8x128xf32>, vector<8x128xf32> -> vector<8x128xf32>
      %c0_12 = arith.constant 0 : index
      %c0_13 = arith.constant 0 : index
      %20 = vector.load %arg7[%c0_12, %c0_13] : memref<1x128xf32, #tpu.memory_space<vmem>>, vector<1x128xf32>
      %21 = vector.broadcast %20 : vector<1x128xf32> to vector<8x128xf32>
      %22 = arith.addf %19, %21 : vector<8x128xf32>
      %cst_14 = arith.constant 0.000000e+00 : f32
      %23 = vector.broadcast %cst_14 : f32 to vector<8x128xf32>
      %24 = arith.maximumf %22, %23 : vector<8x128xf32>
      %c0_15 = arith.constant 0 : index
      %c0_16 = arith.constant 0 : index
      %25 = vector.load %arg8[%c0_15, %c0_16] : memref<128x128xf32, #tpu.memory_space<vmem>>, vector<128x128xf32>
      %cst_17 = arith.constant dense<0.000000e+00> : vector<8x128xf32>
      %26 = tpu.matmul %24, %25, %cst_17 {dimension_numbers = #tpu.dot_dimension_numbers<[1], [0], [0], [1], [0, 0, 1, 1], [], []>} : vector<8x128xf32>, vector<128x128xf32>, vector<8x128xf32> -> vector<8x128xf32>
      %c0_18 = arith.constant 0 : index
      %c0_19 = arith.constant 0 : index
      %27 = vector.load %arg9[%c0_18, %c0_19] : memref<1x128xf32, #tpu.memory_space<vmem>>, vector<1x128xf32>
      %28 = vector.broadcast %27 : vector<1x128xf32> to vector<8x128xf32>
      %29 = arith.addf %26, %28 : vector<8x128xf32>
      %c0_20 = arith.constant 0 : index
      %c0_21 = arith.constant 0 : index
      %30 = vector.load %arg10[%c0_20, %c0_21] : memref<8x128xf32, #tpu.memory_space<vmem>>, vector<8x128xf32>
      tpu.vector_store %arg10[%c0_20, %c0_21], %29 {strides = array<i32>} : memref<8x128xf32, #tpu.memory_space<vmem>>, vector<8x128xf32>,
    } else {
    }
    return
  }
  func.func @transform_0(%arg0: i32, %arg1: memref<2xi32, #tpu.memory_space<smem>>, %arg2: memref<2xi32, #tpu.memory_space<smem>>, %arg3: memref<24xi32, #tpu.memory_space<smem>>, %arg4: memref<6xi32, #tpu.memory_space<smem>>) -> (i32, i32, i32, i32) {
    %c0_i32 = arith.constant 0 : i32
    %c0_i32_0 = arith.constant 0 : i32
    %c0_i32_1 = arith.constant 0 : i32
    %c0_i32_2 = arith.constant 0 : i32
    return %arg0, %c0_i32, %c0_i32_0, %c0_i32_1 : i32, i32, i32, i32
  }
  func.func @transform_1(%arg0: i32, %arg1: memref<2xi32, #tpu.memory_space<smem>>, %arg2: memref<2xi32, #tpu.memory_space<smem>>, %arg3: memref<24xi32, #tpu.memory_space<smem>>, %arg4: memref<6xi32, #tpu.memory_space<smem>>) -> (i32, i32) {
    %c0_i32 = arith.constant 0 : i32
    %c0_i32_0 = arith.constant 0 : i32
    %c0_i32_1 = arith.constant 0 : i32
    return %c0_i32, %c0_i32_0 : i32, i32
  }
  func.func @transform_2(%arg0: i32, %arg1: memref<2xi32, #tpu.memory_space<smem>>, %arg2: memref<2xi32, #tpu.memory_space<smem>>, %arg3: memref<24xi32, #tpu.memory_space<smem>>, %arg4: memref<6xi32, #tpu.memory_space<smem>>) -> (i32, i32) {
    %c0_i32 = arith.constant 0 : i32
    %c0_i32_0 = arith.constant 0 : i32
    %c0_i32_1 = arith.constant 0 : i32
    return %c0_i32, %c0_i32_0 : i32, i32
  }
  func.func @transform_3(%arg0: i32, %arg1: memref<2xi32, #tpu.memory_space<smem>>, %arg2: memref<2xi32, #tpu.memory_space<smem>>, %arg3: memref<24xi32, #tpu.memory_space<smem>>, %arg4: memref<6xi32, #tpu.memory_space<smem>>) -> (i32, i32) {
    %c0_i32 = arith.constant 0 : i32
    %c0_i32_0 = arith.constant 0 : i32
    %c0_i32_1 = arith.constant 0 : i32
    return %c0_i32, %c0_i32_0 : i32, i32
  }
  func.func @transform_4(%arg0: i32, %arg1: memref<2xi32, #tpu.memory_space<smem>>, %arg2: memref<2xi32, #tpu.memory_space<smem>>, %arg3: memref<24xi32, #tpu.memory_space<smem>>, %arg4: memref<6xi32, #tpu.memory_space<smem>>) -> (i32, i32) {
    %c0_i32 = arith.constant 0 : i32
    %c0_i32_0 = arith.constant 0 : i32
    %c0_i32_1 = arith.constant 0 : i32
    return %c0_i32, %c0_i32_0 : i32, i32
  }
  func.func @transform_5(%arg0: i32, %arg1: memref<2xi32, #tpu.memory_space<smem>>, %arg2: memref<2xi32, #tpu.memory_space<smem>>, %arg3: memref<24xi32, #tpu.memory_space<smem>>, %arg4: memref<6xi32, #tpu.memory_space<smem>>) -> (i32, i32) {
    %c0_i32 = arith.constant 0 : i32
    %c0_i32_0 = arith.constant 0 : i32
    %c0_i32_1 = arith.constant 0 : i32
    return %c0_i32, %c0_i32_0 : i32, i32
  }
}

</mosaic_0001>

<bundles_post_ra>
// kernel: tpu_custom_call.1
= control target key start
LH: loop header
LB: loop body
LE: loop exit
PB: predicated region body
PF: predicated region fallthrough
CT: control target
= control target key end

     0   :  { %s2602_s0 = inlined_call_operand.vmem [shape: s32[2], index: 0, kind: input, shape index: {}]   ;;  %s2603_s4 = inlined_call_operand.vmem [shape: bf16[2,16,16,8], index: 4, kind: input, shape index: {}]   ;;  %s2604_s5 = inlined_call_operand.vmem [shape: f32[8,128], index: 5, kind: input, shape index: {}]   ;;  %s2605_s6 = inlined_call_operand.vmem [shape: f32[1,128], index: 6, kind: input, shape index: {}]   ;;  %s2606_s7 = inlined_call_operand.vmem [shape: f32[128,128], index: 7, kind: input, shape index: {}]   ;;  %s2607_s8 = inlined_call_operand.vmem [shape: f32[1,128], index: 8, kind: input, shape index: {}]   ;;  %s2608_s9 = inlined_call_operand.hbm [shape: f32[8,128], index: 9, kind: output, shape index: {}]   ;;  %s2609_s1 = inlined_call_operand.vmem [shape: s32[2], index: 1, kind: input, shape index: {}]   ;;  %s2610_s2 = inlined_call_operand.vmem [shape: s32[24], index: 2, kind: input, shape index: {}]   ;;  %s2611_s3 = inlined_call_operand.vmem [shape: s32[6], index: 3, kind: input, shape index: {}]  }
   0x1   :  { %s14_s11 = sshll.u32 %s2602_s0, 4  ;;  %s18_s14 = sshll.u32 %s2609_s1, 4  ;;  %s15_s11 = int_to_ptr.vmem [resolvable:$true] %s14_s11  ;;  %s19_s14 = int_to_ptr.vmem [resolvable:$true] %s18_s14 }
   0x2   :  { %s1465_s15 = scalar_lea.vmem %s15_s11, 16  ;;  %p1470_p1 = scmp.lt.s32.totalorder %s15_s11, %s15_s11 }
   0x3   :  { %p1466_p0 = scmp.ne.s32.totalorder %s15_s11, %s1465_s15  ;;  %p1471_p2 = scmp.lt.s32.totalorder %s1465_s15, %s1465_s15 }
   0x5   :  { %p1472_p3 = por %p1471_p2, %p1470_p1 }
   0x7   :  { %p1473_p4 = pnand %p1472_p3, %p1466_p0 }
   0x9   :  { %1476 = shalt.err (!%p1473_p4)  }
   0xa   :  { %s1561_s16 = smov [#allocation4]   ;;  %s1477_s17 = scalar_lea.vmem %s19_s14, 16 }
   0xb   :  { %17 = dma.vmem_to_smem %s15_s11, 16, %s1561_s16, [#allocation3] }
   0xc   :  { %p1478_p5 = scmp.ne.s32.totalorder %s19_s14, %s1477_s17  ;;  %p1482_p6 = scmp.lt.s32.totalorder %s19_s14, %s19_s14 }
   0xd   :  { %p1483_p7 = scmp.lt.s32.totalorder %s1477_s17, %s1477_s17 }
   0xf   :  { %p1484_p8 = por %p1483_p7, %p1482_p6 }
  0x11   :  { %p1485_p9 = pnand %p1484_p8, %p1478_p5 }
  0x13   :  { %1488 = shalt.err (!%p1485_p9)  }
  0x14   :  { %s1562_s0 = smov [#allocation5]   ;;  %s22_s19 = sshll.u32 %s2610_s2, 4  ;;  %s23_s19 = int_to_ptr.vmem [resolvable:$true] %s22_s19 }
  0x15   :  { %21 = dma.vmem_to_smem %s19_s14, 16, %s1562_s0, [#allocation3] }
  0x16   :  { %s26_s22 = sshll.u32 %s2611_s3, 4  ;;  %s1489_s23 = scalar_lea.vmem %s23_s19, 16  ;;  %s27_s22 = int_to_ptr.vmem [resolvable:$true] %s26_s22 }
  0x17   :  { %p1490_p10 = scmp.ne.s32.totalorder %s23_s19, %s1489_s23  ;;  %p1494_p11 = scmp.lt.s32.totalorder %s23_s19, %s23_s19 }
  0x18   :  { %p1495_p12 = scmp.lt.s32.totalorder %s1489_s23, %s1489_s23 }
  0x1a   :  { %p1496_p13 = por %p1495_p12, %p1494_p11 }
  0x1c   :  { %p1497_p0 = pnand %p1496_p13, %p1490_p10 }
  0x1e   :  { %1500 = shalt.err (!%p1497_p0)  }
  0x1f   :  { %s1563_s24 = smov [#allocation6]   ;;  %s1501_s25 = scalar_lea.vmem %s27_s22, 16 }
  0x20   :  { %25 = dma.vmem_to_smem %s23_s19, 16, %s1563_s24, [#allocation3] }
  0x21   :  { %p1502_p1 = scmp.ne.s32.totalorder %s27_s22, %s1501_s25  ;;  %p1506_p2 = scmp.lt.s32.totalorder %s27_s22, %s27_s22 }
  0x22   :  { %p1507_p3 = scmp.lt.s32.totalorder %s1501_s25, %s1501_s25 }
  0x24   :  { %p1508_p4 = por %p1507_p3, %p1506_p2 }
  0x26   :  { %p1509_p5 = pnand %p1508_p4, %p1502_p1 }
  0x28   :  { %1512 = shalt.err (!%p1509_p5)  }
  0x29   :  { %s1564_s2 = smov [#allocation7]  }
  0x2a   :  { %29 = dma.vmem_to_smem %s27_s22, 16, %s1564_s2, [#allocation3] }
  0x2b   :  { %1547 = dma.done.wait [#allocation3], 64 }
  0x2c   :  { %1548 = vsyncadd [#allocation3], 4294967232 }
  0x2d   :  { %31 = sfence }
  0x2e   :  { %32 = vsyncpa [#allocation9], 0  ;;  %s1632_s3 = smov 0  }
  0x2f LB: > { %s1638_s26 = sadd.s32 4294967295, %s1555_s3   ;;  %p1185_p6 = scmp.ge.s32.totalorder %s1555_s3, 1  ;;  %s1555_s3 = sphi %s1632_s3, %s38_s3  }
  0x30   : > { %p205_p7 = scmp.lt.s32.totalorder %s1555_s3, 3 }
  0x32   : > { %p206_p8 = pnand %p1185_p6, %p205_p7 }
  0x34   : > { %209 = sbr.rel (%p206_p8) target bundleno = 739 (0x2e3), region = 40 }
  0x3b   : > { %p228_p9 = scmp.lt.s32.totalorder %s1638_s26, 1  ;;  %p1188_p10 = scmp.ne.s32.totalorder %s1638_s26, 0 }
  0x3c   : > { %vm237_vm0 = vcmask (!%p1188_p10), 64512   ;;  %v1565_v0 = vmov (!%p1188_p10), 0.0  }
  0x3d   : > { %s229_s27 = scalar_select %p228_p9, %s1638_s26, 1 }
  0x3e   : > { %236 = sbr.rel (%p1188_p10) target bundleno = 69 (0x45), region = 44  ;;  %238 = vst.msk [vmem:[#allocation2] sm:$0xff] (!%p1188_p10), %vm237_vm0, %v1565_v0 }
  0x3f   : > { %s1239_s28 = sshll.u32 %s229_s27, 7 }
  0x40   : > { %s1647_s10 = scalar_lea.vmem %s2603_s4, %s1239_s28 }
  0x45 PF: > { %v1651_v1 = vld [vmem:[%s1647_s10] sm:$0xff]   ;;  %v1654_v2 = vld [vmem:[%s1647_s10 + $0x8] sm:$0xff]   ;;  %v1657_v3 = vld [vmem:[%s1647_s10 + $0x10] sm:$0xff]   ;;  %v303_v4 = vlaneseq  ;;  %s1660_s11 = sld [smem:[#allocation4 + %s1638_s26]] }
  0x46   : > { %2650 = vst [vmem:[#allocation12_spill] sm:$0xff] %v1651_v1  ;;  %2651 = vst [vmem:[#allocation13_spill] sm:$0xff] %v1654_v2  ;;  %s1663_s12 = sld [smem:[#allocation5 + %s1638_s26]]  ;;  %v1670_v9 = vld [vmem:[%s1647_s10 + $0x18] sm:$0xff]   ;;  %v1673_v10 = vld [vmem:[%s1647_s10 + $0x20] sm:$0xff]  }
  0x47   : > { %2652 = vst [vmem:[#allocation14_spill] sm:$0xff] %v1657_v3  ;;  %2653 = vst [vmem:[#allocation15_spill] sm:$0xff] %v1670_v9  ;;  %v1676_v11 = vld [vmem:[%s1647_s10 + $0x28] sm:$0xff]   ;;  %v1683_v16 = vld [vmem:[%s1647_s10 + $0x30] sm:$0xff]   ;;  %v1736_v50 = vshrl.u32 %v303_v4, 7 }
  0x48   : > { %2654 = vst [vmem:[#allocation16_spill] sm:$0xff] %v1673_v10  ;;  %2655 = vst [vmem:[#allocation17_spill] sm:$0xff] %v1676_v11  ;;  %v1686_v17 = vld [vmem:[%s1647_s10 + $0x38] sm:$0xff]   ;;  %v1689_v18 = vld [vmem:[%s1647_s10 + $0x40] sm:$0xff]  }
  0x49   : > { %2656 = vst [vmem:[#allocation18_spill] sm:$0xff] %v1683_v16  ;;  %2657 = vst [vmem:[#allocation19_spill] sm:$0xff] %v1686_v17  ;;  %v1696_v23 = vld [vmem:[%s1647_s10 + $0x48] sm:$0xff]   ;;  %v1699_v24 = vld [vmem:[%s1647_s10 + $0x50] sm:$0xff]   ;;  %v1739_v51 = vadd.s32 8, %v1736_v50 }
  0x4a   : > { %2658 = vst [vmem:[#allocation20_spill] sm:$0xff] %v1689_v18  ;;  %2659 = vst [vmem:[#allocation21_spill] sm:$0xff] %v1696_v23  ;;  %v1702_v25 = vld [vmem:[%s1647_s10 + $0x58] sm:$0xff]   ;;  %v1709_v30 = vld [vmem:[%s1647_s10 + $0x60] sm:$0xff]  }
  0x4b   : > { %2660 = vst [vmem:[#allocation22_spill] sm:$0xff] %v1699_v24  ;;  %v1712_v31 = vld [vmem:[%s1647_s10 + $0x68] sm:$0xff]   ;;  %v1719_v36 = vld [vmem:[%s1647_s10 + $0x70] sm:$0xff]   ;;  %v1722_v37 = vld [vmem:[%s1647_s10 + $0x78] sm:$0xff]  }
  0x4c   : > { %2661 = vst [vmem:[#allocation23_spill] sm:$0xff] %v1719_v36  ;;  %2662 = vst [vmem:[#allocation24_spill] sm:$0xff] %v1722_v37  ;;  %p1189_p11 = scmp.le.s32.totalorder %s1663_s12, 0 }
  0x4d   : > { %s1742_s13 = smov (!%p1189_p11), 0  }
  0x4e   : > { %1162 = sbr.rel (%p1189_p11) target bundleno = 276 (0x114), region = 77 }
  0x55 LB: >> { %v2663_v24 = vld [vmem:[#allocation22_spill] sm:$0xff]  ;;  %v2664_v23 = vld [vmem:[#allocation21_spill] sm:$0xff]  ;;  %v2665_v18 = vld [vmem:[#allocation20_spill] sm:$0xff]  ;;  %s1749_s14 = sadd.s32 %s1559_s13, %s1660_s11  ;;  %vm447_vm5 = vcmask 64512   ;;  %v2702_v40 = vunpack.c.l.bf16 %v1702_v25  ;;  %v2703_v41 = vunpack.c.h.bf16 %v1702_v25  ;;  %v2704_v42 = vunpack.c.l.bf16 %v1709_v30  ;;  %s311_s13 = sadd.s32 1, %s1559_s13   ;;  %s1559_s13 = sphi %s1742_s13, %s311_s13  }
  0x56   : >> { %v2666_v17 = vld [vmem:[#allocation19_spill] sm:$0xff]  ;;  %v2667_v16 = vld [vmem:[#allocation18_spill] sm:$0xff]  ;;  %v2668_v11 = vld [vmem:[#allocation17_spill] sm:$0xff]  ;;  %s1190_s15 = sshll.u32 %s1749_s14, 2  ;;  %v2696_v32 = vunpack.c.l.bf16 %v2665_v18  ;;  %v2697_v33 = vunpack.c.h.bf16 %v2665_v18  ;;  %v2698_v34 = vunpack.c.l.bf16 %v2664_v23  ;;  %v2699_v35 = vunpack.c.h.bf16 %v2664_v23 }
  0x57   : >> { %v2669_v10 = vld [vmem:[#allocation16_spill] sm:$0xff]  ;;  %v2670_v9 = vld [vmem:[#allocation15_spill] sm:$0xff]  ;;  %v2671_v3 = vld [vmem:[#allocation14_spill] sm:$0xff]  ;;  %s1752_s16 = sld [smem:[#allocation6 + %s1190_s15]]  ;;  %s317_s17 = sadd.s32 1, %s1190_s15  ;;  %v2690_v21 = vunpack.c.l.bf16 %v2668_v11  ;;  %v2691_v22 = vunpack.c.h.bf16 %v2668_v11  ;;  %v2692_v26 = vunpack.c.l.bf16 %v2667_v16  ;;  %v2693_v27 = vunpack.c.h.bf16 %v2667_v16 }
  0x58   : >> { %v2672_v2 = vld [vmem:[#allocation13_spill] sm:$0xff]  ;;  %v2673_v1 = vld [vmem:[#allocation12_spill] sm:$0xff]  ;;  %v2674_v36 = vld [vmem:[#allocation23_spill] sm:$0xff]  ;;  %s1754_s0 = sld [smem:[#allocation6 + %s317_s17]]  ;;  %s319_s1 = sadd.s32 2, %s1190_s15  ;;  %v2682_v12 = vunpack.c.l.bf16 %v2671_v3  ;;  %v2683_v14 = vunpack.c.l.bf16 %v2670_v9  ;;  %v2686_v13 = vunpack.c.h.bf16 %v2671_v3  ;;  %v2687_v15 = vunpack.c.h.bf16 %v2670_v9 }
  0x59   : >> { %v2675_v37 = vld [vmem:[#allocation24_spill] sm:$0xff]  ;;  %s320_s18 = sld [smem:[#allocation6 + %s319_s1]]  ;;  %s321_s19 = sadd.s32 3, %s1190_s15  ;;  %v2680_v5 = vunpack.c.l.bf16 %v2673_v1  ;;  %v2681_v7 = vunpack.c.l.bf16 %v2672_v2  ;;  %v2684_v6 = vunpack.c.h.bf16 %v2673_v1  ;;  %v2685_v8 = vunpack.c.h.bf16 %v2672_v2 }
  0x5a   : >> { %s322_s20 = sld [smem:[#allocation6 + %s321_s19]]  ;;  %v2688_v19 = vunpack.c.l.bf16 %v2669_v10  ;;  %v2689_v20 = vunpack.c.h.bf16 %v2669_v10  ;;  %v2694_v28 = vunpack.c.l.bf16 %v2666_v17  ;;  %v2695_v29 = vunpack.c.h.bf16 %v2666_v17 }
  0x5b   : >> { %v2700_v38 = vunpack.c.l.bf16 %v2663_v24  ;;  %v2701_v39 = vunpack.c.h.bf16 %v2663_v24  ;;  %v2705_v43 = vunpack.c.h.bf16 %v1709_v30  ;;  %v2706_v44 = vunpack.c.l.bf16 %v1712_v31 }
  0x5c   : >> { %v2707_v45 = vunpack.c.h.bf16 %v1712_v31  ;;  %v2708_v46 = vunpack.c.l.bf16 %v2674_v36  ;;  %v2709_v47 = vunpack.c.h.bf16 %v2674_v36  ;;  %v2710_v48 = vunpack.c.l.bf16 %v2675_v37 }
  0x5d   : >> { %v2711_v49 = vunpack.c.h.bf16 %v2675_v37  ;;  %vm2623_vm8 = vcmask 1041409   ;;  %vm2619_vm9 = vcmask 1042434   ;;  %vm2618_vm10 = vcmask 1043459  }
  0x5e   : >> { %vm2620_vm11 = vcmask 1044484   ;;  %vm2621_vm12 = vcmask 1045509   ;;  %vm2622_vm13 = vcmask 1046534   ;;  %vm2627_vm0 = vcmask 1047559  }
  0x5f   : >> { %s323_s21 = ssub.s32 %s320_s18, %s1752_s16 }
  0x60   : >> { %s324_s22 = sadd.s32 1, %s323_s21  ;;  %s327_s23 = ssub.s32 %s322_s20, %s1754_s0 }
  0x61   : >> { %p325_p12 = scmp.gt.s32.totalorder %s324_s22, 1  ;;  %s328_s24 = sadd.s32 1, %s327_s23 }
  0x62   : >> { %p329_p13 = scmp.gt.s32.totalorder %s328_s24, 1 }
  0x63   : >> { %s2803_s22 = smov (!%p325_p12, %s324_s22), 1 }
  0x64   : >> { %s2801_s24 = smov (!%p329_p13, %s328_s24), 1  ;;  %s335_s27 = scvt.s32.f32 %s2803_s22 }
  0x65   : >> { %s331_s25 = scvt.s32.f32 %s2801_s24 }
  0x66   : >> { %s1759_s18 = smul.f32 0.5, %s335_s27 }
  0x67   : >> { %s334_s2 = smul.f32 0.5, %s331_s25 }
  0x68   : >> { %s387_s21 = smul.f32 0.0, %s1759_s18  ;;  %s395_s24 = sceil.f32 %s1759_s18 }
  0x69   : >> { %s339_s28 = smul.f32 0.0, %s334_s2  ;;  %s347_s29 = sceil.f32 %s334_s2 }
  0x6a   : >> { %s1421_s30 = scvt.f32.s32 %s347_s29  ;;  %s363_s15 = sfloor.f32 %s334_s2 }
  0x6b   : >> { %s340_s10 = sfloor.f32 %s339_s28  ;;  %s1423_s20 = scvt.f32.s32 %s363_s15 }
  0x6c   : >> { %s1419_s17 = scvt.f32.s32 %s340_s10  ;;  %s349_s1 = sadd.s32 %s1421_s30, %s1754_s0 }
  0x6d   : >> { %p350_p0 = scmp.gt.s32.totalorder %s349_s1, 0  ;;  %p1196_p2 = scmp.lt.s32.totalorder %s349_s1, 16 }
  0x6e   : >> { %s342_s19 = sadd.s32 %s1419_s17, %s1754_s0  ;;  %s365_s22 = sadd.s32 %s1423_s20, %s1754_s0 }
  0x6f   : >> { %p343_p1 = scmp.gt.s32.totalorder %s342_s19, 0  ;;  %s2805_s1 = smov (!%p350_p0, %s349_s1), 0 }
  0x70   : >> { %p1191_p3 = scmp.lt.s32.totalorder %s342_s19, 16  ;;  %s2809_s1 = smov (!%p1196_p2, %s2805_s1), 16 }
  0x71   : >> { %s2807_s19 = smov (!%p343_p1, %s342_s19), 0  ;;  %s370_s23 = smul.f32 2.0, %s334_s2 }
  0x72   : >> { %p366_p4 = scmp.gt.s32.totalorder %s365_s22, 0  ;;  %s388_s27 = sfloor.f32 %s387_s21 }
  0x73   : >> { %s371_s25 = sceil.f32 %s370_s23  ;;  %s2811_s19 = smov (!%p1191_p3, %s2807_s19), 16 }
  0x74   : >> { %s1425_s28 = scvt.f32.s32 %s371_s25  ;;  %s1427_s29 = scvt.f32.s32 %s388_s27 }
  0x75   : >> { %s367_s30 = scalar_select %p366_p4, %s365_s22, 0 }
  0x76   : >> { %s373_s10 = sadd.s32 %s1425_s28, %s1754_s0  ;;  %s390_s15 = sadd.s32 %s1427_s29, %s1752_s16 }
  0x77   : >> { %p374_p5 = scmp.gt.s32.totalorder %s373_s10, 0  ;;  %p391_p6 = scmp.gt.s32.totalorder %s390_s15, 0 }
  0x78   : >> { %p1211_p7 = scmp.lt.s32.totalorder %s390_s15, 16  ;;  %p1201_p8 = scmp.lt.s32.totalorder %s365_s22, 16 }
  0x79   : >> { %s1429_s17 = scvt.f32.s32 %s395_s24  ;;  %s2813_s15 = smov (!%p391_p6, %s390_s15), 0 }
  0x7a   : >> { %s375_s20 = scalar_select %p374_p5, %s373_s10, 0 }
  0x7b   : >> { %s2815_s15 = smov (!%p1211_p7, %s2813_s15), 16  ;;  %p1206_p9 = scmp.lt.s32.totalorder %s373_s10, 16 }
  0x7c   : >> { %s397_s2 = sadd.s32 %s1429_s17, %s1752_s16  ;;  %s2817_s30 = smov (!%p1201_p8, %s367_s30), 16  ;;  %v402_v52 = vstv %s2815_s15 }
  0x7d   : >> { %p398_p10 = scmp.gt.s32.totalorder %s397_s2, 0  ;;  %p1216_p11 = scmp.lt.s32.totalorder %s397_s2, 16  ;;  %vm403_vm1 = vcmp.ge.s32.totalorder %v1736_v50, %v402_v52  ;;  %vm404_vm2 = vcmp.ge.s32.totalorder %v1739_v51, %v402_v52 }
  0x7e   : >> { %s2821_s20 = smov (!%p1206_p9, %s375_s20), 16  ;;  %s680_s0 = smul.f32 2.0, %s1759_s18 }
  0x7f   : >> { %s2819_s2 = smov (!%p398_p10, %s397_s2), 0  ;;  %s673_s21 = sfloor.f32 %s1759_s18 }
  0x80   : >> { %s2823_s2 = smov (!%p1216_p11, %s2819_s2), 16  ;;  %s2006_s22 = sceil.f32 %s680_s0 }
  0x81   : >> { %v405_v53 = vstv %s2823_s2  ;;  %s1431_s18 = scvt.f32.s32 %s673_s21  ;;  %s1433_s23 = scvt.f32.s32 %s2006_s22 }
  0x82   : >> { %vm406_vm3 = vcmp.lt.s32.totalorder %v1736_v50, %v405_v53  ;;  %vm407_vm4 = vcmp.lt.s32.totalorder %v1739_v51, %v405_v53  ;;  %p362_p2 = scmp.le.s32.totalorder %s2809_s1, %s2811_s19  ;;  %p410_p3 = scmp.le.s32.totalorder %s2823_s2, %s2815_s15 }
  0x83   : >> { %vm1790_vm6 = vmand %vm403_vm1, %vm406_vm3  ;;  %s2022_s24 = sadd.s32 %s1431_s18, %s1752_s16  ;;  %s2027_s25 = sadd.s32 %s1433_s23, %s1752_s16 }
  0x84   : >> { %vm1794_vm7 = vmand %vm404_vm2, %vm407_vm4  ;;  %v415_v60 = vsel %vm1790_vm6, %v2680_v5, -inf  ;;  %v417_v61 = vsel %vm1790_vm6, %v2681_v7, -inf  ;;  %v419_v62 = vsel %vm1790_vm6, %v2682_v12, -inf  ;;  %v421_v63 = vsel %vm1790_vm6, %v2683_v14, -inf  ;;  %p676_p12 = scmp.gt.s32.totalorder %s2022_s24, 0  ;;  %p684_p13 = scmp.gt.s32.totalorder %s2027_s25, 0 }
  0x85   : >> { %v416_v0 = vsel %vm1794_vm7, %v2684_v6, -inf  ;;  %v418_v4 = vsel %vm1794_vm7, %v2685_v8, -inf  ;;  %v420_v52 = vsel %vm1794_vm7, %v2686_v13, -inf  ;;  %v422_v53 = vsel %vm1794_vm7, %v2687_v15, -inf  ;;  %p1221_p0 = scmp.lt.s32.totalorder %s2022_s24, 16  ;;  %p1226_p1 = scmp.lt.s32.totalorder %s2027_s25, 16 }
  0x86   : >> { %v423_v14 = vsel %vm1790_vm6, %v2688_v19, -inf  ;;  %v424_v8 = vsel %vm1794_vm7, %v2689_v20, -inf  ;;  %v425_v13 = vsel %vm1790_vm6, %v2690_v21, -inf  ;;  %v426_v15 = vsel %vm1794_vm7, %v2691_v22, -inf  ;;  %s677_s16 = scalar_select %p676_p12, %s2022_s24, 0 }
  0x87   : >> { %v427_v19 = vsel %vm1790_vm6, %v2692_v26, -inf  ;;  %v428_v20 = vsel %vm1794_vm7, %v2693_v27, -inf  ;;  %v429_v21 = vsel %vm1790_vm6, %v2694_v28, -inf  ;;  %v430_v22 = vsel %vm1794_vm7, %v2695_v29, -inf  ;;  %s685_s27 = scalar_select %p684_p13, %s2027_s25, 0 }
  0x88   : >> { %v1866_v26 = vsel %vm1790_vm6, %v2696_v32, -inf  ;;  %v1872_v27 = vsel %vm1794_vm7, %v2697_v33, -inf  ;;  %v1878_v28 = vsel %vm1790_vm6, %v2698_v34, -inf  ;;  %v1884_v29 = vsel %vm1794_vm7, %v2699_v35, -inf  ;;  %s2825_s16 = smov (!%p1221_p0, %s677_s16), 16  ;;  %p386_p4 = scmp.le.s32.totalorder %s2821_s20, %s2817_s30 }
  0x89   : >> { %v1890_v32 = vsel %vm1790_vm6, %v2700_v38, -inf  ;;  %v1896_v33 = vsel %vm1794_vm7, %v2701_v39, -inf  ;;  %v1902_v34 = vsel %vm1790_vm6, %v2702_v40, -inf  ;;  %v1908_v35 = vsel %vm1794_vm7, %v2703_v41, -inf  ;;  %s2827_s27 = smov (!%p1226_p1, %s685_s27), 16  ;;  %p2442_p5 = por %p410_p3, %p362_p2 }
  0x8a   : >> { %v1914_v38 = vsel %vm1790_vm6, %v2704_v42, -inf  ;;  %v1920_v39 = vsel %vm1794_vm7, %v2705_v43, -inf  ;;  %v1926_v40 = vsel %vm1790_vm6, %v2706_v44, -inf  ;;  %v1932_v41 = vsel %vm1794_vm7, %v2707_v45, -inf  ;;  %p2452_p6 = por %p410_p3, %p386_p4  ;;  %p696_p7 = scmp.le.s32.totalorder %s2827_s27, %s2825_s16 }
  0x8b   : >> { %v1938_v42 = vsel %vm1790_vm6, %v2708_v46, -inf  ;;  %v1944_v43 = vsel %vm1794_vm7, %v2709_v47, -inf  ;;  %v1950_v44 = vsel %vm1790_vm6, %v2710_v48, -inf  ;;  %v1956_v45 = vsel %vm1794_vm7, %v2711_v49, -inf  ;;  %s647_s10 = scalar_select %p2442_p5, 1, 0 }
  0x8c   : >> { %v448_v46 = vsel %vm447_vm5, %v415_v60, -inf  ;;  %v449_v12 = vsel %vm447_vm5, %v416_v0, -inf  ;;  %v457_v7 = vsel %vm447_vm5, %v417_v61, -inf  ;;  %v458_v47 = vsel %vm447_vm5, %v418_v4, -inf  ;;  %s668_s15 = scalar_select %p2452_p6, 1, 0 }
  0x8d   : >> { %v450_v6 = vmax.f32 %v448_v46, %v449_v12  ;;  %v459_v5 = vmax.f32 %v457_v7, %v458_v47  ;;  %v466_v58 = vsel %vm447_vm5, %v419_v62, -inf  ;;  %v467_v48 = vsel %vm447_vm5, %v420_v52, -inf  ;;  %p2488_p8 = por %p696_p7, %p362_p2  ;;  %p2505_p9 = por %p696_p7, %p386_p4 }
  0x8e   : >> { %v468_v57 = vmax.f32 %v466_v58, %v467_v48  ;;  %v475_v56 = vsel %vm447_vm5, %v421_v63, -inf  ;;  %v476_v59 = vsel %vm447_vm5, %v422_v53, -inf  ;;  %v484_v49 = vsel %vm447_vm5, %v423_v14, -inf  ;;  %p310_p10 = scmp.ge.s32.totalorder %s311_s13, %s1663_s12 }
  0x8f   : >> { %v451_v60 = vrot.slane %v450_v6, 4  ;;  %v460_v55 = vrot.slane %v459_v5, 4  ;;  %v477_v0 = vmax.f32 %v475_v56, %v476_v59  ;;  %v485_v61 = vsel %vm447_vm5, %v424_v8, -inf  ;;  %s938_s2 = scalar_select %p2505_p9, 1, 0 }
  0x90   : >> { %v469_v54 = vrot.slane %v468_v57, 4  ;;  %v486_v4 = vmax.f32 %v484_v49, %v485_v61  ;;  %v493_v7 = vsel %vm447_vm5, %v425_v13, -inf  ;;  %v494_v12 = vsel %vm447_vm5, %v426_v15, -inf }
  0x91   : >> { %v452_v46 = vmax.f32 %v450_v6, %v451_v60  ;;  %v461_v47 = vmax.f32 %v459_v5, %v460_v55  ;;  %v478_v48 = vrot.slane %v477_v0, 4  ;;  %v495_v62 = vmax.f32 %v493_v7, %v494_v12 }
  0x92   : >> { %v470_v63 = vmax.f32 %v468_v57, %v469_v54  ;;  %v487_v52 = vrot.slane %v486_v4, 4  ;;  %v502_v53 = vsel %vm447_vm5, %v427_v19, -inf  ;;  %v503_v14 = vsel %vm447_vm5, %v428_v20, -inf }
  0x93   : >> { %v453_v58 = vrot.slane %v452_v46, 2  ;;  %v462_v56 = vrot.slane %v461_v47, 2  ;;  %v479_v59 = vmax.f32 %v477_v0, %v478_v48  ;;  %v496_v8 = vrot.slane %v495_v62, 4 }
  0x94   : >> { %v471_v37 = vrot.slane %v470_v63, 2  ;;  %v488_v49 = vmax.f32 %v486_v4, %v487_v52  ;;  %v504_v61 = vmax.f32 %v502_v53, %v503_v14  ;;  %v511_v13 = vsel %vm447_vm5, %v429_v21, -inf }
  0x95   : >> { %v454_v15 = vmax.f32 %v452_v46, %v453_v58  ;;  %v463_v6 = vmax.f32 %v461_v47, %v462_v56  ;;  %v480_v5 = vrot.slane %v479_v59, 2  ;;  %v497_v55 = vmax.f32 %v495_v62, %v496_v8 }
  0x96   : >> { %v472_v60 = vmax.f32 %v470_v63, %v471_v37  ;;  %v489_v54 = vrot.slane %v488_v49, 2  ;;  %v505_v57 = vrot.slane %v504_v61, 4  ;;  %v512_v19 = vsel %vm447_vm5, %v430_v22, -inf }
  0x97   : >> { %v455_v7 = vrot.slane %v454_v15, 1  ;;  %v464_v20 = vrot.slane %v463_v6, 1  ;;  %v481_v12 = vmax.f32 %v479_v59, %v480_v5  ;;  %v498_v36 = vrot.slane %v497_v55, 2 }
  0x98   : >> { %v473_v0 = vrot.slane %v472_v60, 1  ;;  %v490_v48 = vmax.f32 %v488_v49, %v489_v54  ;;  %v506_v4 = vmax.f32 %v504_v61, %v505_v57  ;;  %v513_v52 = vmax.f32 %v511_v13, %v512_v19 }
  0x99   : >> { %v1974_v53 = vmax.f32 %v454_v15, %v455_v7  ;;  %v1976_v21 = vmax.f32 %v463_v6, %v464_v20  ;;  %v482_v46 = vrot.slane %v481_v12, 1  ;;  %v499_v47 = vmax.f32 %v497_v55, %v498_v36 }
  0x9a   : >> { %v1978_v37 = vmax.f32 %v472_v60, %v473_v0  ;;  %v491_v62 = vrot.slane %v490_v48, 1  ;;  %v507_v22 = vrot.slane %v506_v4, 2  ;;  %v514_v63 = vrot.slane %v513_v52, 4 }
  0x9b   : >> { %v1980_v14 = vmax.f32 %v481_v12, %v482_v46  ;;  %v500_v58 = vrot.slane %v499_v47, 1  ;;  %v520_v56 = vsel %vm447_vm5, %v1866_v26, -inf  ;;  %v521_v59 = vsel %vm447_vm5, %v1872_v27, -inf }
  0x9c   : >> { %v1987_v8 = vmax.f32 %v490_v48, %v491_v62  ;;  %v508_v49 = vmax.f32 %v506_v4, %v507_v22  ;;  %v515_v36 = vmax.f32 %v513_v52, %v514_v63  ;;  %v522_v61 = vmax.f32 %v520_v56, %v521_v59 }
  0x9d   : >> { %v1989_v13 = vmax.f32 %v499_v47, %v500_v58  ;;  %v529_v15 = vsel %vm447_vm5, %v1878_v28, -inf  ;;  %v530_v6 = vsel %vm447_vm5, %v1884_v29, -inf  ;;  %v538_v26 = vsel %vm447_vm5, %v1890_v32, -inf }
  0x9e   : >> { %v509_v5 = vrot.slane %v508_v49, 1  ;;  %v516_v27 = vrot.slane %v515_v36, 2  ;;  %v523_v55 = vrot.slane %v522_v61, 4  ;;  %v531_v60 = vmax.f32 %v529_v15, %v530_v6 }
  0x9f   : >> { %v539_v54 = vsel %vm447_vm5, %v1896_v33, -inf  ;;  %v547_v57 = vsel %vm447_vm5, %v1902_v34, -inf  ;;  %v548_v28 = vsel %vm447_vm5, %v1908_v35, -inf  ;;  %v556_v29 = vsel %vm447_vm5, %v1914_v38, -inf }
  0xa0   : >> { %v2008_v32 = vmax.f32 %v508_v49, %v509_v5  ;;  %v517_v19 = vmax.f32 %v515_v36, %v516_v27  ;;  %v524_v7 = vmax.f32 %v522_v61, %v523_v55  ;;  %v532_v20 = vrot.slane %v531_v60, 4 }
  0xa1   : >> { %v540_v33 = vmax.f32 %v538_v26, %v539_v54  ;;  %v549_v12 = vmax.f32 %v547_v57, %v548_v28  ;;  %v557_v34 = vsel %vm447_vm5, %v1920_v39, -inf  ;;  %v565_v35 = vsel %vm447_vm5, %v1926_v40, -inf }
  0xa2   : >> { %v518_v38 = vrot.slane %v517_v19, 1  ;;  %v525_v0 = vrot.slane %v524_v7, 2  ;;  %v533_v48 = vmax.f32 %v531_v60, %v532_v20  ;;  %v558_v4 = vmax.f32 %v556_v29, %v557_v34 }
  0xa3   : >> { %v541_v52 = vrot.slane %v540_v33, 4  ;;  %v550_v46 = vrot.slane %v549_v12, 4  ;;  %v566_v47 = vsel %vm447_vm5, %v1932_v41, -inf  ;;  %v574_v62 = vsel %vm447_vm5, %v1938_v42, -inf }
  0xa4   : >> { %v2019_v39 = vmax.f32 %v517_v19, %v518_v38  ;;  %v526_v40 = vmax.f32 %v524_v7, %v525_v0  ;;  %v534_v22 = vrot.slane %v533_v48, 2  ;;  %v559_v63 = vrot.slane %v558_v4, 4 }
  0xa5   : >> { %v542_v58 = vmax.f32 %v540_v33, %v541_v52  ;;  %v551_v56 = vmax.f32 %v549_v12, %v550_v46  ;;  %v567_v59 = vmax.f32 %v565_v35, %v566_v47  ;;  %v575_v41 = vsel %vm447_vm5, %v1944_v43, -inf }
  0xa6   : >> { %v527_v42 = vrot.slane %v526_v40, 1  ;;  %v535_v49 = vmax.f32 %v533_v48, %v534_v22  ;;  %v560_v36 = vmax.f32 %v558_v4, %v559_v63  ;;  %v576_v61 = vmax.f32 %v574_v62, %v575_v41 }
  0xa7   : >> { %v2712_v15 = vstv %s2811_s19  ;;  %v2715_v26 = vstv %s2809_s1  ;;  %v543_v43 = vrot.slane %v542_v58, 2  ;;  %v552_v27 = vrot.slane %v551_v56, 2 }
  0xa8   : >> { %vm2032_vm14 = vcmp.ge.s32.totalorder %v1736_v50, %v2712_v15  ;;  %vm2039_vm15 = vcmp.lt.s32.totalorder %v1736_v50, %v2715_v26  ;;  %v568_v55 = vrot.slane %v567_v59, 4  ;;  %v583_v60 = vsel %vm447_vm5, %v1950_v44, -inf }
  0xa9   : >> { %v2718_v54 = vstv %s2817_s30  ;;  %v528_v28 = vmax.f32 %v526_v40, %v527_v42  ;;  %v536_v29 = vrot.slane %v535_v49, 1  ;;  %v561_v19 = vrot.slane %v560_v36, 2  ;;  %vm2624_vm6 = vmand %vm2032_vm14, %vm2039_vm15 }
  0xaa   : >> { %vm2049_vm1 = vcmp.ge.s32.totalorder %v1736_v50, %v2718_v54  ;;  %v577_v7 = vrot.slane %v576_v61, 4  ;;  %v544_v20 = vmax.f32 %v542_v58, %v543_v43  ;;  %v553_v33 = vmax.f32 %v551_v56, %v552_v27 }
  0xab   : >> { %v569_v12 = vmax.f32 %v567_v59, %v568_v55  ;;  %v584_v44 = vsel %vm447_vm5, %v1956_v45, -inf  ;;  %v537_v34 = vmax.f32 %v535_v49, %v536_v29  ;;  %v562_v35 = vmax.f32 %v560_v36, %v561_v19 }
  0xac   : >> { %v578_v38 = vmax.f32 %v576_v61, %v577_v7  ;;  %v585_v0 = vmax.f32 %v583_v60, %v584_v44  ;;  %v545_v48 = vrot.slane %v544_v20, 1  ;;  %v554_v4 = vrot.slane %v553_v33, 1 }
  0xad   : >> { %v570_v52 = vrot.slane %v569_v12, 2  ;;  %v613_v46 = vsel %vm2623_vm8, %v1976_v21, %v1974_v53  ;;  %v563_v47 = vrot.slane %v562_v35, 1  ;;  %v2721_v41 = vstv %s2821_s20 }
  0xae   : >> { %v579_v45 = vrot.slane %v578_v38, 2  ;;  %v586_v62 = vrot.slane %v585_v0, 4  ;;  %v615_v40 = vsel %vm2619_vm9, %v1978_v37, %v613_v46  ;;  %v546_v22 = vmax.f32 %v544_v20, %v545_v48 }
  0xaf   : >> { %v555_v63 = vmax.f32 %v553_v33, %v554_v4  ;;  %v571_v58 = vmax.f32 %v569_v12, %v570_v52  ;;  %v617_v56 = vsel %vm2618_vm10, %v1980_v14, %v615_v40  ;;  %v564_v53 = vmax.f32 %v562_v35, %v563_v47 }
  0xb0   : >> { %v580_v21 = vmax.f32 %v578_v38, %v579_v45  ;;  %v587_v59 = vmax.f32 %v585_v0, %v586_v62  ;;  %v619_v37 = vsel %vm2620_vm11, %v1987_v8, %v617_v56  ;;  %vm2076_vm2 = vcmp.lt.s32.totalorder %v1736_v50, %v2721_v41 }
  0xb1   : >> { %v2722_v42 = vmov 0  ;;  %v572_v49 = vrot.slane %v571_v58, 1  ;;  %v621_v14 = vsel %vm2621_vm12, %v1989_v13, %v619_v37  ;;  %v626_v36 = vsel %vm2623_vm8, %v537_v34, %v528_v28 }
  0xb2   : >> { %v2723_v42 = vsel %vm2076_vm2, 4294967295, %v2722_v42  ;;  %v581_v61 = vrot.slane %v580_v21, 1  ;;  %v588_v15 = vrot.slane %v587_v59, 2  ;;  %v623_v26 = vsel %vm2622_vm13, %v2008_v32, %v621_v14 }
  0xb3   : >> { %v627_v8 = vsel %vm2619_vm9, %v546_v22, %v626_v36  ;;  %v2724_v43 = vstv %s2811_s19  ;;  %v2727_v13 = vstv %s2809_s1  ;;  %v573_v60 = vmax.f32 %v571_v58, %v572_v49  ;;  %vm2625_vm9 = vmand %vm2049_vm1, %vm2076_vm2  ;;  %s921_s19 = scalar_select %p2488_p8, 1, 0 }
  0xb4   : >> { %vm2093_vm3 = vcmp.ge.s32.totalorder %v1739_v51, %v2724_v43  ;;  %vm2100_vm4 = vcmp.lt.s32.totalorder %v1739_v51, %v2727_v13  ;;  %v628_v32 = vsel %vm2618_vm10, %v555_v63, %v627_v8  ;;  %v582_v54 = vmax.f32 %v580_v21, %v581_v61 }
  0xb5   : >> { %v589_v28 = vmax.f32 %v587_v59, %v588_v15  ;;  %v625_v29 = vsel %vm2627_vm0, %v2019_v39, %v623_v26  ;;  %v629_v19 = vsel %vm2620_vm11, %v564_v53, %v628_v32  ;;  %v2730_v7 = vstv %s2817_s30  ;;  %s943_s30 = sld [smem:[#allocation7 + %s1749_s14]] }
  0xb6   : >> { %vm2119_vm7 = vcmp.ge.s32.totalorder %v1739_v51, %v2730_v7  ;;  %v2733_v33 = vmov %v2721_v41  ;;  %v630_v39 = vsel %vm2621_vm12, %v573_v60, %v629_v19  ;;  %v635_v35 = vsel %vm2624_vm6, %v625_v29, -inf  ;;  %vm2736_vm12 = vmand %vm2093_vm3, %vm2100_vm4 }
  0xb7   : >> { %vm2126_vm10 = vcmp.lt.s32.totalorder %v1739_v51, %v2733_v33  ;;  %v590_v44 = vrot.slane %v589_v28, 1  ;;  %v631_v34 = vsel %vm2622_vm13, %v582_v54, %v630_v39  ;;  %v688_v38 = vstv %s2825_s16 }
  0xb8   : >> { %v691_v0 = vstv %s2827_s27  ;;  %v656_v4 = vsel %vm2625_vm9, %v625_v29, -inf  ;;  %vm689_vm13 = vcmp.ge.s32.totalorder %v1736_v50, %v688_v38  ;;  %vm690_vm6 = vcmp.ge.s32.totalorder %v1739_v51, %v688_v38  ;;  %vm2737_vm9 = vmand %vm2119_vm7, %vm2126_vm10 }
  0xb9   : >> { %v591_v48 = vmax.f32 %v589_v28, %v590_v44  ;;  %vm692_vm8 = vcmp.lt.s32.totalorder %v1736_v50, %v691_v0  ;;  %vm693_vm11 = vcmp.lt.s32.totalorder %v1739_v51, %v691_v0  ;;  %v637_v46 = vsel %vm447_vm5, %v635_v35, -inf }
  0xba   : >> { %v658_v62 = vsel %vm447_vm5, %v656_v4, -inf  ;;  %vm2173_vm2 = vmand %vm689_vm13, %vm692_vm8  ;;  %v2742_v21 = vunpack.c.l.bf16 %v2673_v1  ;;  %v2743_v37 = vunpack.c.h.bf16 %v2673_v1  ;;  %v2744_v49 = vunpack.c.l.bf16 %v2672_v2 }
  0xbb   : >> { %v632_v52 = vsel %vm2627_vm0, %v591_v48, %v631_v34  ;;  %vm2179_vm0 = vmand %vm690_vm6, %vm693_vm11  ;;  %v2745_v36 = vunpack.c.l.bf16 %v2671_v3  ;;  %v2746_v26 = vunpack.c.h.bf16 %v2672_v2  ;;  %v2747_v43 = vunpack.c.h.bf16 %v2671_v3  ;;  %s945_s20 = scalar_lea.vmem [#allocation2], %s943_s30 }
  0xbc   : >> { %v636_v47 = vsel %vm2736_vm12, %v632_v52, -inf  ;;  %v657_v45 = vsel %vm2737_vm9, %v632_v52, -inf  ;;  %v701_v59 = vsel %vm2173_vm2, %v2742_v21, -inf  ;;  %v702_v41 = vsel %vm2179_vm0, %v2743_v37, -inf }
  0xbd   : >> { %v638_v22 = vsel %vm447_vm5, %v636_v47, -inf  ;;  %v659_v63 = vsel %vm447_vm5, %v657_v45, -inf  ;;  %v703_v14 = vsel %vm2173_vm2, %v2744_v49, -inf  ;;  %v705_v61 = vsel %vm2173_vm2, %v2745_v36, -inf }
  0xbe   : >> { %v639_v56 = vmax.f32 %v637_v46, %v638_v22  ;;  %v2183_v53 = vmax.f32 %v658_v62, %v659_v63  ;;  %v704_v8 = vsel %vm2179_vm0, %v2746_v26, -inf  ;;  %v706_v13 = vsel %vm2179_vm0, %v2747_v43, -inf }
  0xbf   : >> { %v2748_v60 = vunpack.c.l.bf16 %v2670_v9  ;;  %v2749_v54 = vunpack.c.h.bf16 %v2670_v9  ;;  %v2750_v29 = vunpack.c.l.bf16 %v2669_v10  ;;  %v2751_v7 = vunpack.c.h.bf16 %v2669_v10  ;;  %v2773_v9 = vld [vmem:[#allocation24_spill] sm:$0xff] }
  0xc0   : >> { %v640_v15 = vrot.slane %v639_v56, 4  ;;  %v2752_v39 = vunpack.c.l.bf16 %v2668_v11  ;;  %v2753_v35 = vunpack.c.h.bf16 %v2668_v11  ;;  %v2754_v0 = vunpack.c.l.bf16 %v2667_v16 }
  0xc1   : >> { %v707_v32 = vsel %vm2173_vm2, %v2748_v60, -inf  ;;  %v708_v28 = vsel %vm2179_vm0, %v2749_v54, -inf  ;;  %v709_v19 = vsel %vm2173_vm2, %v2750_v29, -inf  ;;  %v710_v33 = vsel %vm2179_vm0, %v2751_v7, -inf }
  0xc2   : >> { %v711_v44 = vsel %vm2173_vm2, %v2752_v39, -inf  ;;  %v712_v38 = vsel %vm2179_vm0, %v2753_v35, -inf  ;;  %v713_v48 = vsel %vm2173_vm2, %v2754_v0, -inf  ;;  %v2755_v4 = vunpack.c.h.bf16 %v2667_v16 }
  0xc3   : >> { %v2756_v46 = vunpack.c.l.bf16 %v2666_v17  ;;  %v2757_v45 = vunpack.c.h.bf16 %v2666_v17  ;;  %v2758_v22 = vunpack.c.l.bf16 %v2665_v18  ;;  %v2759_v21 = vunpack.c.h.bf16 %v2665_v18 }
  0xc4   : >> { %v714_v52 = vsel %vm2179_vm0, %v2755_v4, -inf  ;;  %v2262_v49 = vmax.f32 %v639_v56, %v640_v15  ;;  %v2760_v36 = vunpack.c.l.bf16 %v2664_v23  ;;  %v2761_v43 = vunpack.c.h.bf16 %v2664_v23 }
  0xc5   : >> { %v715_v47 = vsel %vm2173_vm2, %v2756_v46, -inf  ;;  %v716_v62 = vsel %vm2179_vm0, %v2757_v45, -inf  ;;  %v2254_v63 = vsel %vm2173_vm2, %v2758_v22, -inf  ;;  %v2260_v37 = vsel %vm2179_vm0, %v2759_v21, -inf }
  0xc6   : >> { %v2268_v26 = vsel %vm2173_vm2, %v2760_v36, -inf  ;;  %v2274_v60 = vsel %vm2179_vm0, %v2761_v43, -inf  ;;  %v2762_v54 = vunpack.c.l.bf16 %v2663_v24  ;;  %v2763_v56 = vunpack.c.h.bf16 %v2663_v24 }
  0xc7   : >> { %v2764_v7 = vunpack.c.l.bf16 %v1702_v25  ;;  %v2765_v35 = vunpack.c.h.bf16 %v1702_v25  ;;  %v733_v4 = vsel %vm447_vm5, %v701_v59, -inf  ;;  %v2766_v46 = vunpack.c.l.bf16 %v1709_v30 }
  0xc8   : >> { %v2280_v29 = vsel %vm2173_vm2, %v2762_v54, -inf  ;;  %v2286_v15 = vsel %vm2179_vm0, %v2763_v56, -inf  ;;  %v734_v22 = vsel %vm447_vm5, %v702_v41, -inf  ;;  %v742_v21 = vsel %vm447_vm5, %v703_v14, -inf }
  0xc9   : >> { %v2292_v39 = vsel %vm2173_vm2, %v2764_v7, -inf  ;;  %v2298_v0 = vsel %vm2179_vm0, %v2765_v35, -inf  ;;  %v2305_v45 = vsel %vm2173_vm2, %v2766_v46, -inf  ;;  %v743_v36 = vsel %vm447_vm5, %v704_v8, -inf }
  0xca   : >> { %v2767_v43 = vunpack.c.h.bf16 %v1709_v30  ;;  %v735_v56 = vmax.f32 %v733_v4, %v734_v22  ;;  %v744_v59 = vmax.f32 %v742_v21, %v743_v36  ;;  %v751_v7 = vsel %vm447_vm5, %v705_v61, -inf  ;;  %v2770_v36 = vld [vmem:[#allocation23_spill] sm:$0xff] }
  0xcb   : >> { %v2768_v35 = vunpack.c.l.bf16 %v1712_v31  ;;  %v752_v41 = vsel %vm447_vm5, %v706_v13, -inf  ;;  %v760_v14 = vsel %vm447_vm5, %v707_v32, -inf  ;;  %v761_v8 = vsel %vm447_vm5, %v708_v28, -inf }
  0xcc   : >> { %v2314_v54 = vsel %vm2179_vm0, %v2767_v43, -inf  ;;  %v2769_v34 = vunpack.c.h.bf16 %v1712_v31  ;;  %v736_v22 = vrot.slane %v735_v56, 4  ;;  %v745_v61 = vrot.slane %v744_v59, 4 }
  0xcd   : >> { %v2321_v46 = vsel %vm2173_vm2, %v2768_v35, -inf  ;;  %v769_v21 = vsel %vm447_vm5, %v709_v19, -inf  ;;  %v2771_v43 = vunpack.c.l.bf16 %v2770_v36  ;;  %v753_v13 = vmax.f32 %v751_v7, %v752_v41 }
  0xce   : >> { %v2330_v4 = vsel %vm2179_vm0, %v2769_v34, -inf  ;;  %v762_v32 = vmax.f32 %v760_v14, %v761_v8  ;;  %v770_v28 = vsel %vm447_vm5, %v710_v33, -inf  ;;  %v2772_v1 = vunpack.c.h.bf16 %v2770_v36 }
  0xcf   : >> { %v2337_v35 = vsel %vm2173_vm2, %v2771_v43, -inf  ;;  %v737_v2 = vmax.f32 %v735_v56, %v736_v22  ;;  %v746_v3 = vmax.f32 %v744_v59, %v745_v61  ;;  %v778_v19 = vsel %vm447_vm5, %v711_v44, -inf }
  0xd0   : >> { %v2344_v34 = vsel %vm2179_vm0, %v2772_v1, -inf  ;;  %v2774_v10 = vunpack.c.l.bf16 %v2773_v9  ;;  %v754_v7 = vrot.slane %v753_v13, 4  ;;  %v763_v41 = vrot.slane %v762_v32, 4 }
  0xd1   : >> { %v771_v14 = vmax.f32 %v769_v21, %v770_v28  ;;  %v738_v33 = vrot.slane %v737_v2, 2  ;;  %v747_v8 = vrot.slane %v746_v3, 2  ;;  %v779_v36 = vsel %vm447_vm5, %v712_v38, -inf }
  0xd2   : >> { %v2351_v43 = vsel %vm2173_vm2, %v2774_v10, -inf  ;;  %v787_v1 = vsel %vm447_vm5, %v713_v48, -inf  ;;  %v755_v11 = vmax.f32 %v753_v13, %v754_v7  ;;  %v764_v56 = vmax.f32 %v762_v32, %v763_v41 }
  0xd3   : >> { %v772_v59 = vrot.slane %v771_v14, 4  ;;  %v780_v22 = vmax.f32 %v778_v19, %v779_v36  ;;  %v739_v44 = vmax.f32 %v737_v2, %v738_v33  ;;  %v748_v61 = vmax.f32 %v746_v3, %v747_v8 }
  0xd4   : >> { %v788_v16 = vsel %vm447_vm5, %v714_v52, -inf  ;;  %v796_v10 = vsel %vm447_vm5, %v715_v47, -inf  ;;  %v756_v40 = vrot.slane %v755_v11, 2  ;;  %v765_v17 = vrot.slane %v764_v56, 2 }
  0xd5   : >> { %v773_v18 = vmax.f32 %v771_v14, %v772_v59  ;;  %v781_v21 = vrot.slane %v780_v22, 4  ;;  %v740_v28 = vrot.slane %v739_v44, 1  ;;  %v749_v23 = vrot.slane %v748_v61, 1 }
  0xd6   : >> { %v789_v24 = vmax.f32 %v787_v1, %v788_v16  ;;  %v797_v38 = vsel %vm447_vm5, %v716_v62, -inf  ;;  %v757_v48 = vmax.f32 %v755_v11, %v756_v40  ;;  %v766_v13 = vmax.f32 %v764_v56, %v765_v17 }
  0xd7   : >> { %v774_v32 = vrot.slane %v773_v18, 2  ;;  %v782_v7 = vmax.f32 %v780_v22, %v781_v21  ;;  %v2775_v2 = vunpack.c.h.bf16 %v2773_v9  ;;  %v2364_v52 = vmax.f32 %v739_v44, %v740_v28 }
  0xd8   : >> { %v790_v47 = vrot.slane %v789_v24, 4  ;;  %v798_v19 = vmax.f32 %v796_v10, %v797_v38  ;;  %v758_v41 = vrot.slane %v757_v48, 1  ;;  %v767_v14 = vrot.slane %v766_v13, 1 }
  0xd9   : >> { %v2362_v3 = vsel %vm2179_vm0, %v2775_v2, -inf  ;;  %v775_v33 = vmax.f32 %v773_v18, %v774_v32  ;;  %v783_v16 = vrot.slane %v782_v7, 2  ;;  %v805_v11 = vsel %vm447_vm5, %v2254_v63, -inf }
  0xda   : >> { %v791_v8 = vmax.f32 %v789_v24, %v790_v47  ;;  %v799_v62 = vrot.slane %v798_v19, 4  ;;  %v806_v9 = vsel %vm447_vm5, %v2260_v37, -inf  ;;  %v2370_v17 = vmax.f32 %v748_v61, %v749_v23 }
  0xdb   : >> { %v2372_v58 = vmax.f32 %v757_v48, %v758_v41  ;;  %v776_v36 = vrot.slane %v775_v33, 1  ;;  %v784_v1 = vmax.f32 %v782_v7, %v783_v16  ;;  %v807_v22 = vmax.f32 %v805_v11, %v806_v9 }
  0xdc   : >> { %v792_v56 = vrot.slane %v791_v8, 2  ;;  %v800_v59 = vmax.f32 %v798_v19, %v799_v62  ;;  %v814_v18 = vsel %vm447_vm5, %v2268_v26, -inf  ;;  %v2376_v24 = vmax.f32 %v766_v13, %v767_v14 }
  0xdd   : >> { %v785_v44 = vrot.slane %v784_v1, 1  ;;  %v815_v63 = vsel %vm447_vm5, %v2274_v60, -inf  ;;  %v823_v23 = vsel %vm447_vm5, %v2280_v29, -inf  ;;  %v808_v10 = vrot.slane %v807_v22, 4 }
  0xde   : >> { %v793_v37 = vmax.f32 %v791_v8, %v792_v56  ;;  %v801_v61 = vrot.slane %v800_v59, 2  ;;  %v816_v40 = vmax.f32 %v814_v18, %v815_v63  ;;  %v2382_v21 = vmax.f32 %v775_v33, %v776_v36 }
  0xdf   : >> { %v824_v28 = vsel %vm447_vm5, %v2286_v15, -inf  ;;  %v832_v26 = vsel %vm447_vm5, %v2292_v39, -inf  ;;  %v833_v38 = vsel %vm447_vm5, %v2298_v0, -inf  ;;  %v809_v13 = vmax.f32 %v807_v22, %v808_v10 }
  0xe0   : >> { %v794_v48 = vrot.slane %v793_v37, 1  ;;  %v802_v60 = vmax.f32 %v800_v59, %v801_v61  ;;  %v817_v32 = vrot.slane %v816_v40, 4  ;;  %v825_v29 = vmax.f32 %v823_v23, %v824_v28 }
  0xe1   : >> { %v834_v7 = vmax.f32 %v832_v26, %v833_v38  ;;  %v841_v2 = vsel %vm447_vm5, %v2305_v45, -inf  ;;  %v842_v47 = vsel %vm447_vm5, %v2314_v54, -inf  ;;  %v786_v19 = vmax.f32 %v784_v1, %v785_v44 }
  0xe2   : >> { %v2394_v15 = vmax.f32 %v793_v37, %v794_v48  ;;  %v810_v41 = vrot.slane %v809_v13, 2  ;;  %v818_v39 = vmax.f32 %v816_v40, %v817_v32  ;;  %v826_v14 = vrot.slane %v825_v29, 4 }
  0xe3   : >> { %v835_v33 = vrot.slane %v834_v7, 4  ;;  %v843_v0 = vmax.f32 %v841_v2, %v842_v47  ;;  %v850_v16 = vsel %vm447_vm5, %v2321_v46, -inf  ;;  %v803_v8 = vrot.slane %v802_v60, 1 }
  0xe4   : >> { %v811_v62 = vmax.f32 %v809_v13, %v810_v41  ;;  %v819_v11 = vrot.slane %v818_v39, 2  ;;  %v851_v45 = vsel %vm447_vm5, %v2330_v4, -inf  ;;  %v827_v9 = vmax.f32 %v825_v29, %v826_v14 }
  0xe5   : >> { %v836_v36 = vmax.f32 %v834_v7, %v835_v33  ;;  %v844_v54 = vrot.slane %v843_v0, 4  ;;  %v852_v1 = vmax.f32 %v850_v16, %v851_v45  ;;  %v859_v22 = vsel %vm447_vm5, %v2337_v35, -inf }
  0xe6   : >> { %v812_v56 = vrot.slane %v811_v62, 1  ;;  %v820_v59 = vmax.f32 %v818_v39, %v819_v11  ;;  %v860_v18 = vsel %vm447_vm5, %v2344_v34, -inf  ;;  %v828_v44 = vrot.slane %v827_v9, 2 }
  0xe7   : >> { %v837_v46 = vrot.slane %v836_v36, 2  ;;  %v845_v63 = vmax.f32 %v843_v0, %v844_v54  ;;  %v853_v23 = vrot.slane %v852_v1, 4  ;;  %v861_v10 = vmax.f32 %v859_v22, %v860_v18 }
  0xe8   : >> { %v813_v37 = vmax.f32 %v811_v62, %v812_v56  ;;  %v821_v61 = vrot.slane %v820_v59, 1  ;;  %v868_v4 = vsel %vm447_vm5, %v2351_v43, -inf  ;;  %v829_v40 = vmax.f32 %v827_v9, %v828_v44 }
  0xe9   : >> { %v838_v28 = vmax.f32 %v836_v36, %v837_v46  ;;  %v846_v26 = vrot.slane %v845_v63, 2  ;;  %v854_v38 = vmax.f32 %v852_v1, %v853_v23  ;;  %v862_v13 = vrot.slane %v861_v10, 4 }
  0xea   : >> { %v822_v48 = vmax.f32 %v820_v59, %v821_v61  ;;  %v869_v35 = vsel %vm447_vm5, %v2362_v3, -inf  ;;  %vm2776_vm8 = vcmask 1041409   ;;  %v830_v32 = vrot.slane %v829_v40, 1 }
  0xeb   : >> { %v893_v34 = vsel %vm2776_vm8, %v2370_v17, %v2364_v52  ;;  %v839_v29 = vrot.slane %v838_v28, 1  ;;  %v847_v7 = vmax.f32 %v845_v63, %v846_v26  ;;  %v855_v2 = vrot.slane %v854_v38, 2  ;;  %vm2778_vm11 = vmmov %vm2776_vm8 }
  0xec   : >> { %v863_v47 = vmax.f32 %v861_v10, %v862_v13  ;;  %v870_v41 = vmax.f32 %v868_v4, %v869_v35  ;;  %vm2777_vm9 = vcmask 1042434   ;;  %v900_v39 = vsel %vm2778_vm11, %v822_v48, %v813_v37 }
  0xed   : >> { %v894_v43 = vsel %vm2777_vm9, %v2372_v58, %v893_v34  ;;  %v831_v14 = vmax.f32 %v829_v40, %v830_v32  ;;  %v840_v33 = vmax.f32 %v838_v28, %v839_v29  ;;  %v848_v3 = vrot.slane %v847_v7, 1  ;;  %vm2781_vm0 = vmmov %vm2777_vm9 }
  0xee   : >> { %v856_v0 = vmax.f32 %v854_v38, %v855_v2  ;;  %v804_v52 = vmax.f32 %v802_v60, %v803_v8  ;;  %v864_v17 = vrot.slane %v863_v47, 2  ;;  %v871_v16 = vrot.slane %v870_v41, 4 }
  0xef   : >> { %vm2779_vm12 = vcmask 1043459   ;;  %v849_v11 = vmax.f32 %v847_v7, %v848_v3  ;;  %vm2780_vm13 = vcmask 1044484   ;;  %v901_v9 = vsel %vm2781_vm0, %v831_v14, %v900_v39  ;;  %vm2792_vm0 = vmand %vm2032_vm14, %vm2039_vm15 }
  0xf0   : >> { %v895_v62 = vsel %vm2779_vm12, %v2376_v24, %v894_v43  ;;  %v857_v58 = vrot.slane %v856_v0, 1  ;;  %v865_v36 = vmax.f32 %v863_v47, %v864_v17  ;;  %v872_v54 = vmax.f32 %v870_v41, %v871_v16  ;;  %vm2783_vm6 = vmmov %vm2779_vm12 }
  0xf1   : >> { %v896_v45 = vsel %vm2780_vm13, %v2382_v21, %v895_v62  ;;  %vm2782_vm2 = vcmask 1045509   ;;  %v902_v60 = vsel %vm2783_vm6, %v840_v33, %v901_v9  ;;  %v2784_v24 = vrot.slane %v2183_v53, 4  ;;  %vm2786_vm9 = vmmov %vm2780_vm13 }
  0xf2   : >> { %v897_v1 = vsel %vm2782_vm2, %v786_v19, %v896_v45  ;;  %v858_v8 = vmax.f32 %v856_v0, %v857_v58  ;;  %vm2785_vm8 = vcmask 1046534   ;;  %v903_v56 = vsel %vm2786_vm9, %v849_v11, %v902_v60  ;;  %vm2788_vm12 = vmmov %vm2782_vm2 }
  0xf3   : >> { %v662_v21 = vmax.f32 %v2183_v53, %v2784_v24  ;;  %v898_v19 = vsel %vm2785_vm8, %v2394_v15, %v897_v1  ;;  %v866_v59 = vrot.slane %v865_v36, 1  ;;  %v873_v22 = vrot.slane %v872_v54, 2  ;;  %vm2791_vm13 = vmmov %vm2785_vm8 }
  0xf4   : >> { %vm2787_vm11 = vcmask 1047559   ;;  %v904_v63 = vsel %vm2788_vm12, %v858_v8, %v903_v56  ;;  %v642_v23 = vrot.slane %v2262_v49, 2  ;;  %vm2793_vm2 = vnez %v2723_v42  ;;  %vm2796_vm15 = vmand %vm2093_vm3, %vm2100_vm4 }
  0xf5   : >> { %v867_v18 = vmax.f32 %v865_v36, %v866_v59  ;;  %v874_v44 = vmax.f32 %v872_v54, %v873_v22  ;;  %v899_v46 = vsel %vm2787_vm11, %v804_v52, %v898_v19  ;;  %v663_v53 = vrot.slane %v662_v21, 2  ;;  %vm2794_vm6 = vmand %vm2049_vm1, %vm2793_vm2 }
  0xf6   : >> { %v909_v61 = vsel %vm2792_vm0, %v899_v46, -inf  ;;  %v926_v10 = vsel %vm2794_vm6, %v899_v46, -inf  ;;  %v643_v40 = vmax.f32 %v2262_v49, %v642_v23  ;;  %vm2795_vm14 = vmmov %vm2787_vm11  ;;  %v648_v13 = vstv %s647_s10 }
  0xf7   : >> { %v875_v15 = vrot.slane %v874_v44, 1  ;;  %v905_v37 = vsel %vm2791_vm13, %v867_v18, %v904_v63  ;;  %v664_v6 = vmax.f32 %v662_v21, %v663_v53  ;;  %v911_v28 = vsel %vm447_vm5, %v909_v61, -inf  ;;  %vm2798_vm1 = vmand %vm2119_vm7, %vm2126_vm10 }
  0xf8   : >> { %v928_v26 = vsel %vm447_vm5, %v926_v10, -inf  ;;  %v644_v55 = vrot.slane %v643_v40, 1  ;;  %v669_v12 = vstv %s668_s15  ;;  %v922_v43 = vstv %s921_s19 }
  0xf9   : >> { %v876_v4 = vmax.f32 %v874_v44, %v875_v15  ;;  %v665_v38 = vrot.slane %v664_v6, 1  ;;  %vm670_vm10 = vcmp.eq.s32.totalorder %v669_v12, 1  ;;  %v939_v39 = vstv %s938_s2 }
  0xfa   : >> { %v645_v32 = vmax.f32 %v643_v40, %v644_v55  ;;  %vm923_vm3 = vcmp.eq.s32.totalorder %v922_v43, 1  ;;  %vm940_vm4 = vcmp.eq.s32.totalorder %v939_v39, 1  ;;  %vm946_vm7 = vcmask 57344  }
  0xfb   : >> { %v906_v5 = vsel %vm2795_vm14, %v876_v4, %v905_v37  ;;  %v666_v29 = vmax.f32 %v664_v6, %v665_v38 }
  0xfc   : >> { %v910_v57 = vsel %vm2796_vm15, %v906_v5, -inf  ;;  %v927_v42 = vsel %vm2798_vm1, %v906_v5, -inf }
  0xfd   : >> { %v912_v49 = vsel %vm447_vm5, %v910_v57, -inf  ;;  %v929_v27 = vsel %vm447_vm5, %v927_v42, -inf  ;;  %vm649_vm5 = vcmp.eq.s32.totalorder %v648_v13, 1  ;;  %v671_v33 = vsel %vm670_vm10, 0.0, %v666_v29 }
  0xfe   : >> { %v913_v48 = vmax.f32 %v911_v28, %v912_v49  ;;  %v930_v20 = vmax.f32 %v928_v26, %v929_v27  ;;  %v650_v14 = vsel %vm649_vm5, 0.0, %v645_v32 }
  0xff   : >> { %v672_v16 = vadd.f32 %v671_v33, %v650_v14 }
 0x100   : >> { %v914_v35 = vrot.slane %v913_v48, 4  ;;  %v931_v34 = vrot.slane %v930_v20, 4 }
 0x102   : >> { %v915_v7 = vmax.f32 %v913_v48, %v914_v35  ;;  %v932_v2 = vmax.f32 %v930_v20, %v931_v34 }
 0x104   : >> { %v916_v47 = vrot.slane %v915_v7, 2  ;;  %v933_v41 = vrot.slane %v932_v2, 2 }
 0x106   : >> { %v917_v3 = vmax.f32 %v915_v7, %v916_v47  ;;  %v934_v0 = vmax.f32 %v932_v2, %v933_v41 }
 0x108   : >> { %v918_v52 = vrot.slane %v917_v3, 1  ;;  %v935_v17 = vrot.slane %v934_v0, 1 }
 0x10a   : >> { %v919_v62 = vmax.f32 %v917_v3, %v918_v52  ;;  %v936_v11 = vmax.f32 %v934_v0, %v935_v17 }
 0x10c   : >> { %v924_v58 = vsel %vm923_vm3, 0.0, %v919_v62  ;;  %v941_v45 = vsel %vm940_vm4, 0.0, %v936_v11 }
 0x10d   : >> { %v925_v9 = vadd.f32 %v924_v58, %v672_v16  ;;  %313 = sbr.rel (!%p310_p10) target bundleno = 85 (0x55), region = 83 }
 0x10f   : >> { %v942_v36 = vadd.f32 %v941_v45, %v925_v9 }
 0x111   : >> { %v944_v54 = vmul.f32 0.25, %v942_v36 }
 0x113   : >> { %947 = vst.msk [vmem:[%s945_s20] sm:$0x1] %vm946_vm7, %v944_v54 }
 0x114 PF: > { %p1231_p11 = scmp.ne.s32.totalorder %s1638_s26, 1 }
 0x115   : > { %v953_v1 = vld [vmem:[%s2604_s5] sm:$0xff] (!%p1231_p11)  ;;  %vm961_vm8 = vcmask (!%p1231_p11), 64512   ;;  %v1566_v24 = vmov (!%p1231_p11), 0.0   ;;  %vm1567_vm9 = vmmov (!%p1231_p11), 0   ;;  %v1037_v25 = vld [vmem:[%s2606_s7 + $0x8] sm:$0xff] (!%p1231_p11)  ;;  %v1038_v30 = vld [vmem:[%s2606_s7 + $0x10] sm:$0xff] (!%p1231_p11) }
 0x116   : > { %951 = sbr.rel (%p1231_p11) target bundleno = 714 (0x2ca), region = 55  ;;  %1354 = vmatprep.subr.mxu0 (!%p1231_p11), %v1566_v24  ;;  %1356 = vmatprep.mubr.msk.f32.mxu0 (!%p1231_p11), %vm1567_vm9, %v1566_v24  ;;  %v1036_v21 = vld [vmem:[%s2606_s7] sm:$0xff] (!%p1231_p11)  ;;  %v1568_v31 = vmov (!%p1231_p11), 0.0|0.0   ;;  %v1039_v51 = vld [vmem:[%s2606_s7 + $0x18] sm:$0xff] (!%p1231_p11)  ;;  %v1041_v56 = vld [vmem:[%s2606_s7 + $0x28] sm:$0xff] (!%p1231_p11) }
 0x117   : > { %1355 = vmatpush3.msra.mxu0 (!%p1231_p11), %v953_v1  ;;  %1394 = vmatprep.subr.bf16.mxu1 (!%p1231_p11), %v1568_v31  ;;  %v1395_v50 = vpack.c.bf16 (!%p1231_p11), %v1037_v25, %v1036_v21  ;;  %v1398_v8 = vpack.c.bf16 (!%p1231_p11), %v1039_v51, %v1038_v30  ;;  %v1040_v19 = vld [vmem:[%s2606_s7 + $0x20] sm:$0xff] (!%p1231_p11)  ;;  %v1042_v22 = vld [vmem:[%s2606_s7 + $0x30] sm:$0xff] (!%p1231_p11)  ;;  %v1043_v18 = vld [vmem:[%s2606_s7 + $0x38] sm:$0xff] (!%p1231_p11) }
 0x118   : > { %1391 = vmatprep.mubr.msk.f32.mxu1 (!%p1231_p11), %vm1567_vm9, %v1566_v24  ;;  %v1401_v59 = vpack.c.bf16 (!%p1231_p11), %v1041_v56, %v1040_v19  ;;  %v1404_v44 = vpack.c.bf16 (!%p1231_p11), %v1043_v18, %v1042_v22  ;;  %v1044_v46 = vld [vmem:[%s2606_s7 + $0x40] sm:$0xff] (!%p1231_p11)  ;;  %v1045_v63 = vld [vmem:[%s2606_s7 + $0x48] sm:$0xff] (!%p1231_p11)  ;;  %v1046_v53 = vld [vmem:[%s2606_s7 + $0x50] sm:$0xff] (!%p1231_p11) }
 0x119   : > { %1396 = vmatpush3.bf16.msra.mxu1 (!%p1231_p11), %v1395_v50  ;;  %v1407_v23 = vpack.c.bf16 (!%p1231_p11), %v1045_v63, %v1044_v46  ;;  %v1047_v15 = vld [vmem:[%s2606_s7 + $0x58] sm:$0xff] (!%p1231_p11)  ;;  %v1048_v61 = vld [vmem:[%s2606_s7 + $0x60] sm:$0xff] (!%p1231_p11)  ;;  %v1049_v10 = vld [vmem:[%s2606_s7 + $0x68] sm:$0xff] (!%p1231_p11) }
 0x11a   : > { %v952_v60 = vld [vmem:[#allocation2] sm:$0xff] (!%p1231_p11)  ;;  %1397 = vmatprep.subr.bf16.mxu1 (!%p1231_p11), %v1568_v31  ;;  %v1410_v37 = vpack.c.bf16 (!%p1231_p11), %v1047_v15, %v1046_v53  ;;  %v1413_v4 = vpack.c.bf16 (!%p1231_p11), %v1049_v10, %v1048_v61  ;;  %v1050_v40 = vld [vmem:[%s2606_s7 + $0x70] sm:$0xff] (!%p1231_p11)  ;;  %v1051_v6 = vld [vmem:[%s2606_s7 + $0x78] sm:$0xff] (!%p1231_p11) }
 0x11b   : > { %1357 = vmatmul.mubr.msk.f32.vlgmr.msra.gmra.mrb[0].mxu0 (!%p1231_p11), %vm961_vm8, %v952_v60  ;;  %v1416_v5 = vpack.c.bf16 (!%p1231_p11), %v1051_v6, %v1050_v40  ;;  %v1232_v28 = vld [vmem:[%s2605_s6] ss:$0 sm:$0xff] (!%p1231_p11) }
 0x11c   : > { %v1234_v27 = vld [vmem:[%s2607_s8] ss:$0 sm:$0xff] (!%p1231_p11) }
 0x11d   : > { %1399 = vmatpush3.bf16.msra.mxu1 %v1398_v8 }
 0x11e   : > { %1400 = vmatprep.subr.bf16.mxu1 %v1568_v31 }
 0x121   : > { %1402 = vmatpush3.bf16.msra.mxu1 %v1401_v59 }
 0x122   : > { %1403 = vmatprep.subr.bf16.mxu1 %v1568_v31 }
 0x125   : > { %1405 = vmatpush3.bf16.msra.mxu1 %v1404_v44 }
 0x126   : > { %1406 = vmatprep.subr.bf16.mxu1 %v1568_v31 }
 0x129   : > { %1408 = vmatpush3.bf16.msra.mxu1 %v1407_v23 }
 0x12a   : > { %1409 = vmatprep.subr.bf16.mxu1 %v1568_v31 }
 0x12d   : > { %1411 = vmatpush3.bf16.msra.mxu1 %v1410_v37 }
 0x12e   : > { %1412 = vmatprep.subr.bf16.mxu1 %v1568_v31 }
 0x131   : > { %1414 = vmatpush3.bf16.msra.mxu1 %v1413_v4 }
 0x132   : > { %1415 = vmatprep.subr.bf16.mxu1 %v1568_v31 }
 0x135   : > { %1417 = vmatpush3.bf16.msra.mxu1 %v1416_v5 }
 0x1ee   : > { %v1031_v26 = vpop.f32.mrb[0].mxu0 }
 0x1ef   : > { %v1032_v57 = vadd.f32 %v1232_v28, %v1031_v26  ;;  %v1358_v42 = vpop.f32.mrb[1].mxu0 }
 0x1f1   : > { %v1035_v49 = vmax.f32 %v1032_v57, 0.0 }
 0x1f3   : > { %1392 = vmatmul.mubr.f32.vlgmr.msra.gmra.mrb[0].mxu1 %v1035_v49 }
 0x2c6   : > { %v1125_v55 = vpop.f32.mrb[0].mxu1 }
 0x2c7   : > { %v1126_v38 = vadd.f32 %v1234_v27, %v1125_v55  ;;  %v1393_v48 = vpop.f32.mrb[1].mxu1 }
 0x2c9   : > { %1129 = vst [vmem:[#allocation8] sm:$0xff] %v1126_v38 }
 0x2ca PF: > { %p1438_p12 = scmp.eq.s32.totalorder %s1638_s26, 1  ;;  %s1569_s10 = smov [#allocation8]  }
 0x2cb   : > { %s1137_s15 = sshll.u32 %s1569_s10, 4  ;;  %s1138_s15 = int_to_ptr.vmem [resolvable:$true] %s1137_s15 }
 0x2cc   : > { %s1513_s17 = scalar_lea.vmem %s1138_s15, 128  ;;  %p1520_p2 = scmp.lt.s32.totalorder %s1138_s15, %s1138_s15 }
 0x2cd   : > { %p1514_p13 = scmp.ne.s32.totalorder %s1138_s15, %s1513_s17  ;;  %p1521_p3 = scmp.lt.s32.totalorder %s1513_s17, %s1513_s17 }
 0x2cf   : > { %p1515_p0 = pnand %p1514_p13, %p1438_p12  ;;  %p1522_p4 = por %p1521_p3, %p1520_p2 }
 0x2d1   : > { %p1516_p1 = pneg %p1515_p0 }
 0x2d3   : > { %p1523_p5 = pnand %p1522_p4, %p1516_p1 }
 0x2d5   : > { %1526 = shalt.err (!%p1523_p5)
}
 0x2d6   : > { %s1527_s2 = scalar_lea.hbm %s2608_s9, 128 }
 0x2d7   : > { %p1528_p6 = scmp.ne.s32.totalorder %s2608_s9, %s1527_s2  ;;  %p1533_p9 = scmp.lt.u32.totalorder %s1527_s2, %s2608_s9 }
 0x2d9   : > { %p1529_p7 = pnand %p1528_p6, %p1438_p12 }
 0x2db   : > { %p1530_p8 = pneg %p1529_p7 }
 0x2dd   : > { %p1535_p10 = pnand %p1533_p9, %p1530_p8 }
 0x2df   : > { %1538 = shalt.err (!%p1535_p10)
}
 0x2e0   : > { %1435 = dma.vmem_to_hbm [thread:$0]  (%p1438_p12), %s1138_s15, 128, %s2608_s9, [#allocation9]  }
 0x2e1   : > { %1550 = dma.done.wait (%p1438_p12), [#allocation9], 128  }
 0x2e2   : > { %1552 = vsyncadd (%p1438_p12), [#allocation9], 4294967168 }
 0x2e3 PF: > { %s38_s3 = sadd.s32 1, %s1555_s3  }
 0x2e4   : > { %p35_p11 = scmp.ge.s32.totalorder %s38_s3, 4  }
 0x2e6   :  { %37 = sbr.rel (!%p35_p11) target bundleno = 47 (0x2f), region = 94 }
 0x2ed   :  { %1150 = vsyncpa [#allocation9], 1 }
 0x2ee   :  { %1152 = vsyncpa [#allocation9 + $0x1], 1 }

</bundles_post_ra>
